<compile_context>
chip_gen: v7x
topology: tpu7x:2x2x1
jax: 0.10.0
libtpu: 0.0.40
codegen_flags: <defaults>
</compile_context>

<pallas_src>
import functools

import numpy as np
import jax
import jax.numpy as jnp
from jax.experimental import pallas as pl
from jax.experimental.pallas import tpu as pltpu

# ---- tiny synthetic config (LLaMA-7B scaled down) ----
VOCAB   = 256   # vocab size
D       = 32    # hidden size          (config.text.hidden_size)
H       = 4     # attention heads
HD      = D // H
F       = 64    # ffn intermediate size
NLAYERS = 2
EPS     = 1e-6
NEG_INF = -1e9

# TODO(synk): tokenizer / HF generate() / LoRA & 4-8bit quantization paths have
# no Pallas equivalent; only the dense forward pass of the causal LM is here.
# NOTE(scaling): if D/F/VOCAB are scaled toward real 7B dims, the full-weight-
# resident BlockSpecs below must become K/N-tiled grid axes (reduction last,
# "arbitrary") with an explicit vmem_limit_bytes — v7x only has 64 MiB VMEM.


# --------------------- fused decoder stack + lm_head kernel ---------------------
def fused_lm_kernel(x_ref, bias_ref, cos_ref, sin_ref,
                    ln1_ref, wqkv_ref, wo_ref, ln2_ref, wgu_ref, wd_ref,
                    lnf_ref, wlm_ref,
                    o_ref,
                    attn_sc):
    x = x_ref[...].astype(jnp.float32)          # (T, D), T = B*S
    bias = bias_ref[...]                        # (T, T) causal+pad+block-diag bias
    cos = cos_ref[...]                          # (T, D), RoPE tables tiled over heads
    sin = sin_ref[...]
    scale = 1.0 / (HD ** 0.5)

    def rmsnorm(v, gain):                       # elementwise math kept in f32 (v5e VPU)
        var = jnp.mean(v * v, axis=-1, keepdims=True)
        return v * jax.lax.rsqrt(var + EPS) * gain

    for li in range(NLAYERS):                   # static unroll over stacked layers
        # --- input RMSNorm + fused QKV (+ pre-rotated q/k) projection ---
        h = rmsnorm(x, ln1_ref[li])                                     # (T, D)
        qkv = jnp.dot(h.astype(jnp.bfloat16), wqkv_ref[li],
                      preferred_element_type=jnp.float32)               # (T, 5D)
        # columns: [ q | q@R | k | k@R | v ]  ->  RoPE without slice/concat
        q = qkv[:, 0 * D:1 * D] * cos + qkv[:, 1 * D:2 * D] * sin
        k = qkv[:, 2 * D:3 * D] * cos + qkv[:, 3 * D:4 * D] * sin
        v = qkv[:, 4 * D:5 * D]

        # --- multi-head causal attention (all batches at once; bias is
        #     block-diagonal over batches so cross-batch scores are masked) ---
        for hh in range(H):                     # static unroll over heads
            sl = slice(hh * HD, (hh + 1) * HD)
            qs = q[:, sl]
            ks = k[:, sl]
            vs = v[:, sl]
            sc = jnp.dot(qs, ks.T, preferred_element_type=jnp.float32) * scale + bias
            sc = sc - jnp.max(sc, axis=-1, keepdims=True)
            e = jnp.exp(sc)
            # NOTE: fully-masked (padded) query rows become a uniform softmax;
            # harmless because the loss masks those rows.
            p = e * pl.reciprocal(jnp.sum(e, axis=-1, keepdims=True), approx=True)
            # write the head result into its lane slice of the VMEM scratch
            attn_sc[:, sl] = jnp.dot(p, vs, preferred_element_type=jnp.float32)

        x = x + jnp.dot(attn_sc[...].astype(jnp.bfloat16), wo_ref[li],
                        preferred_element_type=jnp.float32)

        # --- post-attention RMSNorm + fused SwiGLU MLP ---
        h2 = rmsnorm(x, ln2_ref[li])
        gu = jnp.dot(h2.astype(jnp.bfloat16), wgu_ref[li],
                     preferred_element_type=jnp.float32)                # (T, 2F)
        g = gu[:, :F]
        u = gu[:, F:]
        act = (g * jax.nn.sigmoid(g)) * u                               # SiLU(g)*u
        x = x + jnp.dot(act.astype(jnp.bfloat16), wd_ref[li],
                        preferred_element_type=jnp.float32)

    # --- final RMSNorm + lm_head (kept in f32, matches _keep_in_fp32_modules) ---
    hf = rmsnorm(x, lnf_ref[...])
    o_ref[...] = jnp.dot(hf, wlm_ref[...], preferred_element_type=jnp.float32)


def fused_forward(x, bias, cos, sin, prep):
    T, _ = x.shape

    def spec(shape):
        return pl.BlockSpec(shape, lambda i, _n=len(shape): (0,) * _n)

    return pl.pallas_call(
        fused_lm_kernel,
        out_shape=jax.ShapeDtypeStruct((T, VOCAB), jnp.float32),
        grid_spec=pltpu.PrefetchScalarGridSpec(
            num_scalar_prefetch=0,
            grid=(1,),                       # everything fits in VMEM at these dims
            in_specs=[
                spec((T, D)),                # x (tokens)
                spec((T, T)),                # attention bias
                spec((T, D)),                # rope cos (tiled over heads/batch)
                spec((T, D)),                # rope sin
                spec((NLAYERS, 1, D)),       # ln1 (stacked)
                spec((NLAYERS, D, 5 * D)),   # fused [q | qR | k | kR | v] (bf16)
                spec((NLAYERS, D, D)),       # wo (bf16)
                spec((NLAYERS, 1, D)),       # ln2
                spec((NLAYERS, D, 2 * F)),   # fused [gate | up] (bf16)
                spec((NLAYERS, F, D)),       # wd (bf16)
                spec((1, D)),                # final norm
                spec((D, VOCAB)),            # lm_head (f32)
            ],
            out_specs=spec((T, VOCAB)),
            scratch_shapes=[pltpu.VMEM((T, D), jnp.float32)],   # attention output
        ),
        compiler_params=pltpu.CompilerParams(
            dimension_semantics=("arbitrary",)),
    )(x, bias, cos, sin,
      prep["ln1"], prep["wqkv"], prep["wo"], prep["ln2"], prep["wgu"], prep["wd"],
      prep["lnf"], prep["wlm"])


# ------------------------------- param init --------------------------------
def init_params(key):
    def dense(k, shape, scl=0.05):
        return scl * jax.random.normal(k, shape, dtype=jnp.float32)

    keys = jax.random.split(key, 2 + NLAYERS)
    params = {
        "embed": dense(keys[0], (VOCAB, D), 0.02),
        "lnf": jnp.ones((1, D), jnp.float32),
        "lm_head": dense(keys[1], (D, VOCAB)),
        "layers": [],
    }
    for li in range(NLAYERS):
        lk = jax.random.split(keys[2 + li], 7)
        params["layers"].append({
            "ln1": jnp.ones((1, D), jnp.float32),
            "wq": dense(lk[0], (D, D)),
            "wk": dense(lk[1], (D, D)),
            "wv": dense(lk[2], (D, D)),
            "wo": dense(lk[3], (D, D)),
            "ln2": jnp.ones((1, D), jnp.float32),
            "wg": dense(lk[4], (D, F)),
            "wu": dense(lk[5], (D, F)),
            "wd": dense(lk[6], (F, D)),
        })
    return params


def rope_rotation_matrix():
    """(D, D) block-diagonal matrix R with (x @ R) == rotate_half(x) per head."""
    R = np.zeros((D, D), dtype=np.float32)
    half = HD // 2
    for h in range(H):
        base = h * HD
        for i in range(half):
            R[base + i + half, base + i] = -1.0   # out[:half]  = -x[half:]
            R[base + i, base + i + half] = 1.0    # out[half:]  = +x[:half]
    return jnp.asarray(R)


def prepare_stacked_params(params):
    """Stack per-layer weights, fuse QKV(+RoPE-rotated)/gate-up, cast to bf16."""
    R = rope_rotation_matrix()
    layers = params["layers"]
    prep = {
        "embed": params["embed"],                              # f32 (keep_in_fp32)
        "lnf": params["lnf"],
        "wlm": params["lm_head"],                              # f32 (keep_in_fp32)
        "ln1": jnp.stack([l["ln1"] for l in layers]),
        "ln2": jnp.stack([l["ln2"] for l in layers]),
        "wqkv": jnp.stack([
            jnp.concatenate(
                [l["wq"], l["wq"] @ R, l["wk"], l["wk"] @ R, l["wv"]], axis=1)
            for l in layers]).astype(jnp.bfloat16),            # (NL, D, 5D)
        "wo": jnp.stack([l["wo"] for l in layers]).astype(jnp.bfloat16),
        "wgu": jnp.stack([
            jnp.concatenate([l["wg"], l["wu"]], axis=1)
            for l in layers]).astype(jnp.bfloat16),            # (NL, D, 2F)
        "wd": jnp.stack([l["wd"] for l in layers]).astype(jnp.bfloat16),
    }
    return prep


def rope_tables(S):
    pos = jnp.arange(S, dtype=jnp.float32)
    inv_freq = 1.0 / (10000.0 ** (jnp.arange(0, HD, 2, dtype=jnp.float32) / HD))
    freqs = pos[:, None] * inv_freq[None, :]           # (S, HD//2)
    emb = jnp.concatenate([freqs, freqs], axis=-1)     # (S, HD)
    return jnp.cos(emb), jnp.sin(emb)


# ------------------------------ forward (glue) ------------------------------
@functools.partial(jax.jit, static_argnames=())
def language_model_forward(prep, input_ids, attention_mask, labels):
    B, S = input_ids.shape
    T = B * S

    # embedding lookup: glue gather (tiny table); hot path is in the fused kernel
    x = jnp.take(prep["embed"], input_ids.reshape(T), axis=0)        # (T, D) f32

    # RoPE tables tiled over heads (last axis) and batch (rows)
    cos, sin = rope_tables(S)                                        # (S, HD)
    cos = jnp.tile(cos, (B, H))                                      # (T, D)
    sin = jnp.tile(sin, (B, H))

    # block-diagonal (per batch) causal + key-padding bias, built once in JAX
    bi = jnp.arange(T, dtype=jnp.int32) // S
    si = jnp.arange(T, dtype=jnp.int32) % S
    causal = si[None, :] <= si[:, None]
    same_b = bi[:, None] == bi[None, :]
    pad = attention_mask.reshape(T) > 0
    allow = jnp.logical_and(jnp.logical_and(same_b, causal), pad[None, :])
    bias = jnp.where(allow, 0.0, NEG_INF).astype(jnp.float32)        # (T, T)

    logits = fused_forward(x, bias, cos, sin, prep).reshape(B, S, VOCAB)

    # shifted causal-LM cross-entropy (as HF CausalLMOutput.loss), glue in JAX
    shift_logits = logits[:, :-1, :]
    shift_labels = labels[:, 1:]
    shift_mask = attention_mask[:, 1:].astype(jnp.float32)
    logz = jax.nn.logsumexp(shift_logits, axis=-1)
    tok_logp = jnp.take_along_axis(shift_logits, shift_labels[..., None],
                                   axis=-1)[..., 0]
    nll = (logz - tok_logp) * shift_mask
    loss = jnp.sum(nll) / jnp.maximum(jnp.sum(shift_mask), 1.0)
    return loss, logits


if __name__ == "__main__":
    key = jax.random.PRNGKey(0)
    pkey, dkey = jax.random.split(key)
    params = init_params(pkey)
    prep = prepare_stacked_params(params)

    B, S = 2, 8
    input_ids = jax.random.randint(dkey, (B, S), 0, VOCAB, dtype=jnp.int32)
    attention_mask = jnp.ones((B, S), dtype=jnp.int32)
    labels = input_ids

    loss, logits = language_model_forward(prep, input_ids, attention_mask, labels)
    jax.block_until_ready((loss, logits))
    assert logits.shape == (B, S, VOCAB)
    assert jnp.isfinite(loss)
    print("KERNEL_OK")
</pallas_src>

<mosaic_0001>
module attributes {stable_mosaic.version = 11 : i64} {
  func.func @fused_lm_kernel(%arg0: i32, %arg1: memref<16x32xf32, #tpu.memory_space<vmem>>, %arg2: memref<16x16xf32, #tpu.memory_space<vmem>>, %arg3: memref<16x32xf32, #tpu.memory_space<vmem>>, %arg4: memref<16x32xf32, #tpu.memory_space<vmem>>, %arg5: memref<2x1x32xf32, #tpu.memory_space<vmem>>, %arg6: memref<2x32x160xbf16, #tpu.memory_space<vmem>>, %arg7: memref<2x32x32xbf16, #tpu.memory_space<vmem>>, %arg8: memref<2x1x32xf32, #tpu.memory_space<vmem>>, %arg9: memref<2x32x128xbf16, #tpu.memory_space<vmem>>, %arg10: memref<2x64x32xbf16, #tpu.memory_space<vmem>>, %arg11: memref<1x32xf32, #tpu.memory_space<vmem>>, %arg12: memref<32x256xf32, #tpu.memory_space<vmem>>, %arg13: memref<16x256xf32, #tpu.memory_space<vmem>>, %arg14: memref<16x32xf32, #tpu.memory_space<vmem>>) attributes {dimension_semantics = [#tpu.dimension_semantics<arbitrary>], iteration_bounds = array<i64: 1>, scalar_prefetch = 0 : i64, scratch_operands = 1 : i64, tpu.core_type = #tpu.core_type<tc>, window_params = [{pipeline_mode = #tpu.pipeline_mode<synchronous>, transform_indices = @transform_0, window_bounds = array<i64: 16, 32>}, {pipeline_mode = #tpu.pipeline_mode<synchronous>, transform_indices = @transform_1, window_bounds = array<i64: 16, 16>}, {pipeline_mode = #tpu.pipeline_mode<synchronous>, transform_indices = @transform_2, window_bounds = array<i64: 16, 32>}, {pipeline_mode = #tpu.pipeline_mode<synchronous>, transform_indices = @transform_3, window_bounds = array<i64: 16, 32>}, {pipeline_mode = #tpu.pipeline_mode<synchronous>, transform_indices = @transform_4, window_bounds = array<i64: 2, 1, 32>}, {pipeline_mode = #tpu.pipeline_mode<synchronous>, transform_indices = @transform_5, window_bounds = array<i64: 2, 32, 160>}, {pipeline_mode = #tpu.pipeline_mode<synchronous>, transform_indices = @transform_6, window_bounds = array<i64: 2, 32, 32>}, {pipeline_mode = #tpu.pipeline_mode<synchronous>, transform_indices = @transform_7, window_bounds = array<i64: 2, 1, 32>}, {pipeline_mode = #tpu.pipeline_mode<synchronous>, transform_indices = @transform_8, window_bounds = array<i64: 2, 32, 128>}, {pipeline_mode = #tpu.pipeline_mode<synchronous>, transform_indices = @transform_9, window_bounds = array<i64: 2, 64, 32>}, {pipeline_mode = #tpu.pipeline_mode<synchronous>, transform_indices = @transform_10, window_bounds = array<i64: 1, 32>}, {pipeline_mode = #tpu.pipeline_mode<synchronous>, transform_indices = @transform_11, window_bounds = array<i64: 32, 256>}, {pipeline_mode = #tpu.pipeline_mode<synchronous>, transform_indices = @transform_12, window_bounds = array<i64: 16, 256>}]} {
    %c0 = arith.constant 0 : index
    %c0_0 = arith.constant 0 : index
    %0 = vector.load %arg1[%c0, %c0_0] : memref<16x32xf32, #tpu.memory_space<vmem>>, vector<16x32xf32>
    %c0_1 = arith.constant 0 : index
    %c0_2 = arith.constant 0 : index
    %1 = vector.load %arg2[%c0_1, %c0_2] : memref<16x16xf32, #tpu.memory_space<vmem>>, vector<16x16xf32>
    %c0_3 = arith.constant 0 : index
    %c0_4 = arith.constant 0 : index
    %2 = vector.load %arg3[%c0_3, %c0_4] : memref<16x32xf32, #tpu.memory_space<vmem>>, vector<16x32xf32>
    %c0_5 = arith.constant 0 : index
    %c0_6 = arith.constant 0 : index
    %3 = vector.load %arg4[%c0_5, %c0_6] : memref<16x32xf32, #tpu.memory_space<vmem>>, vector<16x32xf32>
    %c0_7 = arith.constant 0 : index
    %c0_8 = arith.constant 0 : index
    %c0_9 = arith.constant 0 : index
    %4 = vector.load %arg5[%c0_7, %c0_8, %c0_9] : memref<2x1x32xf32, #tpu.memory_space<vmem>>, vector<1x1x32xf32>
    %5 = vector.shape_cast %4 : vector<1x1x32xf32> to vector<1x32xf32>
    %6 = arith.mulf %0, %0 : vector<16x32xf32>
    %cst = arith.constant dense<0.000000e+00> : vector<16xf32>
    %7 = vector.multi_reduction <add>, %6, %cst [1] : vector<16x32xf32> to vector<16xf32>
    %8 = vector.shape_cast %7 : vector<16xf32> to vector<16x1xf32>
    %cst_10 = arith.constant 3.200000e+01 : f32
    %9 = vector.broadcast %cst_10 : f32 to vector<16x1xf32>
    %10 = arith.divf %8, %9 : vector<16x1xf32>
    %cst_11 = arith.constant 9.99999997E-7 : f32
    %11 = vector.broadcast %cst_11 : f32 to vector<16x1xf32>
    %12 = arith.addf %10, %11 : vector<16x1xf32>
    %13 = math.rsqrt %12 : vector<16x1xf32>
    %14 = vector.broadcast %13 : vector<16x1xf32> to vector<16x32xf32>
    %15 = arith.mulf %0, %14 : vector<16x32xf32>
    %16 = vector.broadcast %5 : vector<1x32xf32> to vector<16x32xf32>
    %17 = arith.mulf %15, %16 : vector<16x32xf32>
    %18 = arith.truncf %17 : vector<16x32xf32> to vector<16x32xbf16>
    %c0_12 = arith.constant 0 : index
    %c0_13 = arith.constant 0 : index
    %c0_14 = arith.constant 0 : index
    %19 = vector.load %arg6[%c0_12, %c0_13, %c0_14] : memref<2x32x160xbf16, #tpu.memory_space<vmem>>, vector<1x32x160xbf16>
    %20 = vector.shape_cast %19 : vector<1x32x160xbf16> to vector<32x160xbf16>
    %cst_15 = arith.constant dense<0.000000e+00> : vector<16x160xf32>
    %21 = tpu.matmul %18, %20, %cst_15 {dimension_numbers = #tpu.dot_dimension_numbers<[1], [0], [0], [1], [0, 0, 1, 1], [], []>} : vector<16x32xbf16>, vector<32x160xbf16>, vector<16x160xf32> -> vector<16x160xf32>
    %22 = vector.extract_strided_slice %21 {offsets = [0, 0], sizes = [16, 32], strides = [1, 1]} : vector<16x160xf32> to vector<16x32xf32>
    %23 = arith.mulf %22, %2 : vector<16x32xf32>
    %24 = vector.extract_strided_slice %21 {offsets = [0, 32], sizes = [16, 32], strides = [1, 1]} : vector<16x160xf32> to vector<16x32xf32>
    %25 = arith.mulf %24, %3 : vector<16x32xf32>
    %26 = arith.addf %23, %25 : vector<16x32xf32>
    %27 = vector.extract_strided_slice %21 {offsets = [0, 64], sizes = [16, 32], strides = [1, 1]} : vector<16x160xf32> to vector<16x32xf32>
    %28 = arith.mulf %27, %2 : vector<16x32xf32>
    %29 = vector.extract_strided_slice %21 {offsets = [0, 96], sizes = [16, 32], strides = [1, 1]} : vector<16x160xf32> to vector<16x32xf32>
    %30 = arith.mulf %29, %3 : vector<16x32xf32>
    %31 = arith.addf %28, %30 : vector<16x32xf32>
    %32 = vector.extract_strided_slice %21 {offsets = [0, 128], sizes = [16, 32], strides = [1, 1]} : vector<16x160xf32> to vector<16x32xf32>
    %33 = vector.extract_strided_slice %26 {offsets = [0, 0], sizes = [16, 8], strides = [1, 1]} : vector<16x32xf32> to vector<16x8xf32>
    %34 = vector.extract_strided_slice %31 {offsets = [0, 0], sizes = [16, 8], strides = [1, 1]} : vector<16x32xf32> to vector<16x8xf32>
    %35 = vector.extract_strided_slice %32 {offsets = [0, 0], sizes = [16, 8], strides = [1, 1]} : vector<16x32xf32> to vector<16x8xf32>
    %36 = tpu.transpose %34, [1, 0] : vector<16x8xf32> -> vector<8x16xf32>
    %cst_16 = arith.constant dense<0.000000e+00> : vector<16x16xf32>
    %37 = tpu.matmul %33, %36, %cst_16 {dimension_numbers = #tpu.dot_dimension_numbers<[1], [0], [0], [1], [0, 0, 1, 1], [], []>} : vector<16x8xf32>, vector<8x16xf32>, vector<16x16xf32> -> vector<16x16xf32>
    %cst_17 = arith.constant 0.353553385 : f32
    %38 = vector.broadcast %cst_17 : f32 to vector<16x16xf32>
    %39 = arith.mulf %37, %38 : vector<16x16xf32>
    %40 = arith.addf %39, %1 : vector<16x16xf32>
    %cst_18 = arith.constant dense<0xFF800000> : vector<16xf32>
    %41 = vector.multi_reduction <maximumf>, %40, %cst_18 [1] : vector<16x16xf32> to vector<16xf32>
    %42 = vector.shape_cast %41 : vector<16xf32> to vector<16x1xf32>
    %43 = vector.broadcast %42 : vector<16x1xf32> to vector<16x16xf32>
    %44 = arith.subf %40, %43 : vector<16x16xf32>
    %45 = math.exp %44 : vector<16x16xf32>
    %cst_19 = arith.constant dense<0.000000e+00> : vector<16xf32>
    %46 = vector.multi_reduction <add>, %45, %cst_19 [1] : vector<16x16xf32> to vector<16xf32>
    %47 = vector.shape_cast %46 : vector<16xf32> to vector<16x1xf32>
    %48 = tpu.reciprocal %47 {approx = true} : vector<16x1xf32> -> vector<16x1xf32>
    %49 = vector.broadcast %48 : vector<16x1xf32> to vector<16x16xf32>
    %50 = arith.mulf %45, %49 : vector<16x16xf32>
    %cst_20 = arith.constant dense<0.000000e+00> : vector<16x8xf32>
    %51 = tpu.matmul %50, %35, %cst_20 {dimension_numbers = #tpu.dot_dimension_numbers<[1], [0], [0], [1], [0, 0, 1, 1], [], []>} : vector<16x16xf32>, vector<16x8xf32>, vector<16x8xf32> -> vector<16x8xf32>
    %c0_21 = arith.constant 0 : index
    %c0_22 = arith.constant 0 : index
    %52 = vector.load %arg14[%c0_21, %c0_22] : memref<16x32xf32, #tpu.memory_space<vmem>>, vector<16x8xf32>
    tpu.vector_store %arg14[%c0_21, %c0_22], %51 {strides = array<i32>} : memref<16x32xf32, #tpu.memory_space<vmem>>, vector<16x8xf32>,
    %53 = vector.extract_strided_slice %26 {offsets = [0, 8], sizes = [16, 8], strides = [1, 1]} : vector<16x32xf32> to vector<16x8xf32>
    %54 = vector.extract_strided_slice %31 {offsets = [0, 8], sizes = [16, 8], strides = [1, 1]} : vector<16x32xf32> to vector<16x8xf32>
    %55 = vector.extract_strided_slice %32 {offsets = [0, 8], sizes = [16, 8], strides = [1, 1]} : vector<16x32xf32> to vector<16x8xf32>
    %56 = tpu.transpose %54, [1, 0] : vector<16x8xf32> -> vector<8x16xf32>
    %cst_23 = arith.constant dense<0.000000e+00> : vector<16x16xf32>
    %57 = tpu.matmul %53, %56, %cst_23 {dimension_numbers = #tpu.dot_dimension_numbers<[1], [0], [0], [1], [0, 0, 1, 1], [], []>} : vector<16x8xf32>, vector<8x16xf32>, vector<16x16xf32> -> vector<16x16xf32>
    %cst_24 = arith.constant 0.353553385 : f32
    %58 = vector.broadcast %cst_24 : f32 to vector<16x16xf32>
    %59 = arith.mulf %57, %58 : vector<16x16xf32>
    %60 = arith.addf %59, %1 : vector<16x16xf32>
    %cst_25 = arith.constant dense<0xFF800000> : vector<16xf32>
    %61 = vector.multi_reduction <maximumf>, %60, %cst_25 [1] : vector<16x16xf32> to vector<16xf32>
    %62 = vector.shape_cast %61 : vector<16xf32> to vector<16x1xf32>
    %63 = vector.broadcast %62 : vector<16x1xf32> to vector<16x16xf32>
    %64 = arith.subf %60, %63 : vector<16x16xf32>
    %65 = math.exp %64 : vector<16x16xf32>
    %cst_26 = arith.constant dense<0.000000e+00> : vector<16xf32>
    %66 = vector.multi_reduction <add>, %65, %cst_26 [1] : vector<16x16xf32> to vector<16xf32>
    %67 = vector.shape_cast %66 : vector<16xf32> to vector<16x1xf32>
    %68 = tpu.reciprocal %67 {approx = true} : vector<16x1xf32> -> vector<16x1xf32>
    %69 = vector.broadcast %68 : vector<16x1xf32> to vector<16x16xf32>
    %70 = arith.mulf %65, %69 : vector<16x16xf32>
    %cst_27 = arith.constant dense<0.000000e+00> : vector<16x8xf32>
    %71 = tpu.matmul %70, %55, %cst_27 {dimension_numbers = #tpu.dot_dimension_numbers<[1], [0], [0], [1], [0, 0, 1, 1], [], []>} : vector<16x16xf32>, vector<16x8xf32>, vector<16x8xf32> -> vector<16x8xf32>
    %c0_28 = arith.constant 0 : index
    %c8 = arith.constant 8 : index
    %72 = vector.load %arg14[%c0_28, %c8] : memref<16x32xf32, #tpu.memory_space<vmem>>, vector<16x8xf32>
    tpu.vector_store %arg14[%c0_28, %c8], %71 {strides = array<i32>} : memref<16x32xf32, #tpu.memory_space<vmem>>, vector<16x8xf32>,
    %73 = vector.extract_strided_slice %26 {offsets = [0, 16], sizes = [16, 8], strides = [1, 1]} : vector<16x32xf32> to vector<16x8xf32>
    %74 = vector.extract_strided_slice %31 {offsets = [0, 16], sizes = [16, 8], strides = [1, 1]} : vector<16x32xf32> to vector<16x8xf32>
    %75 = vector.extract_strided_slice %32 {offsets = [0, 16], sizes = [16, 8], strides = [1, 1]} : vector<16x32xf32> to vector<16x8xf32>
    %76 = tpu.transpose %74, [1, 0] : vector<16x8xf32> -> vector<8x16xf32>
    %cst_29 = arith.constant dense<0.000000e+00> : vector<16x16xf32>
    %77 = tpu.matmul %73, %76, %cst_29 {dimension_numbers = #tpu.dot_dimension_numbers<[1], [0], [0], [1], [0, 0, 1, 1], [], []>} : vector<16x8xf32>, vector<8x16xf32>, vector<16x16xf32> -> vector<16x16xf32>
    %cst_30 = arith.constant 0.353553385 : f32
    %78 = vector.broadcast %cst_30 : f32 to vector<16x16xf32>
    %79 = arith.mulf %77, %78 : vector<16x16xf32>
    %80 = arith.addf %79, %1 : vector<16x16xf32>
    %cst_31 = arith.constant dense<0xFF800000> : vector<16xf32>
    %81 = vector.multi_reduction <maximumf>, %80, %cst_31 [1] : vector<16x16xf32> to vector<16xf32>
    %82 = vector.shape_cast %81 : vector<16xf32> to vector<16x1xf32>
    %83 = vector.broadcast %82 : vector<16x1xf32> to vector<16x16xf32>
    %84 = arith.subf %80, %83 : vector<16x16xf32>
    %85 = math.exp %84 : vector<16x16xf32>
    %cst_32 = arith.constant dense<0.000000e+00> : vector<16xf32>
    %86 = vector.multi_reduction <add>, %85, %cst_32 [1] : vector<16x16xf32> to vector<16xf32>
    %87 = vector.shape_cast %86 : vector<16xf32> to vector<16x1xf32>
    %88 = tpu.reciprocal %87 {approx = true} : vector<16x1xf32> -> vector<16x1xf32>
    %89 = vector.broadcast %88 : vector<16x1xf32> to vector<16x16xf32>
    %90 = arith.mulf %85, %89 : vector<16x16xf32>
    %cst_33 = arith.constant dense<0.000000e+00> : vector<16x8xf32>
    %91 = tpu.matmul %90, %75, %cst_33 {dimension_numbers = #tpu.dot_dimension_numbers<[1], [0], [0], [1], [0, 0, 1, 1], [], []>} : vector<16x16xf32>, vector<16x8xf32>, vector<16x8xf32> -> vector<16x8xf32>
    %c0_34 = arith.constant 0 : index
    %c16 = arith.constant 16 : index
    %92 = vector.load %arg14[%c0_34, %c16] : memref<16x32xf32, #tpu.memory_space<vmem>>, vector<16x8xf32>
    tpu.vector_store %arg14[%c0_34, %c16], %91 {strides = array<i32>} : memref<16x32xf32, #tpu.memory_space<vmem>>, vector<16x8xf32>,
    %93 = vector.extract_strided_slice %26 {offsets = [0, 24], sizes = [16, 8], strides = [1, 1]} : vector<16x32xf32> to vector<16x8xf32>
    %94 = vector.extract_strided_slice %31 {offsets = [0, 24], sizes = [16, 8], strides = [1, 1]} : vector<16x32xf32> to vector<16x8xf32>
    %95 = vector.extract_strided_slice %32 {offsets = [0, 24], sizes = [16, 8], strides = [1, 1]} : vector<16x32xf32> to vector<16x8xf32>
    %96 = tpu.transpose %94, [1, 0] : vector<16x8xf32> -> vector<8x16xf32>
    %cst_35 = arith.constant dense<0.000000e+00> : vector<16x16xf32>
    %97 = tpu.matmul %93, %96, %cst_35 {dimension_numbers = #tpu.dot_dimension_numbers<[1], [0], [0], [1], [0, 0, 1, 1], [], []>} : vector<16x8xf32>, vector<8x16xf32>, vector<16x16xf32> -> vector<16x16xf32>
    %cst_36 = arith.constant 0.353553385 : f32
    %98 = vector.broadcast %cst_36 : f32 to vector<16x16xf32>
    %99 = arith.mulf %97, %98 : vector<16x16xf32>
    %100 = arith.addf %99, %1 : vector<16x16xf32>
    %cst_37 = arith.constant dense<0xFF800000> : vector<16xf32>
    %101 = vector.multi_reduction <maximumf>, %100, %cst_37 [1] : vector<16x16xf32> to vector<16xf32>
    %102 = vector.shape_cast %101 : vector<16xf32> to vector<16x1xf32>
    %103 = vector.broadcast %102 : vector<16x1xf32> to vector<16x16xf32>
    %104 = arith.subf %100, %103 : vector<16x16xf32>
    %105 = math.exp %104 : vector<16x16xf32>
    %cst_38 = arith.constant dense<0.000000e+00> : vector<16xf32>
    %106 = vector.multi_reduction <add>, %105, %cst_38 [1] : vector<16x16xf32> to vector<16xf32>
    %107 = vector.shape_cast %106 : vector<16xf32> to vector<16x1xf32>
    %108 = tpu.reciprocal %107 {approx = true} : vector<16x1xf32> -> vector<16x1xf32>
    %109 = vector.broadcast %108 : vector<16x1xf32> to vector<16x16xf32>
    %110 = arith.mulf %105, %109 : vector<16x16xf32>
    %cst_39 = arith.constant dense<0.000000e+00> : vector<16x8xf32>
    %111 = tpu.matmul %110, %95, %cst_39 {dimension_numbers = #tpu.dot_dimension_numbers<[1], [0], [0], [1], [0, 0, 1, 1], [], []>} : vector<16x16xf32>, vector<16x8xf32>, vector<16x8xf32> -> vector<16x8xf32>
    %c0_40 = arith.constant 0 : index
    %c24 = arith.constant 24 : index
    %112 = vector.load %arg14[%c0_40, %c24] : memref<16x32xf32, #tpu.memory_space<vmem>>, vector<16x8xf32>
    tpu.vector_store %arg14[%c0_40, %c24], %111 {strides = array<i32>} : memref<16x32xf32, #tpu.memory_space<vmem>>, vector<16x8xf32>,
    %c0_41 = arith.constant 0 : index
    %c0_42 = arith.constant 0 : index
    %113 = vector.load %arg14[%c0_41, %c0_42] : memref<16x32xf32, #tpu.memory_space<vmem>>, vector<16x32xf32>
    %114 = arith.truncf %113 : vector<16x32xf32> to vector<16x32xbf16>
    %c0_43 = arith.constant 0 : index
    %c0_44 = arith.constant 0 : index
    %c0_45 = arith.constant 0 : index
    %115 = vector.load %arg7[%c0_43, %c0_44, %c0_45] : memref<2x32x32xbf16, #tpu.memory_space<vmem>>, vector<1x32x32xbf16>
    %116 = vector.shape_cast %115 : vector<1x32x32xbf16> to vector<32x32xbf16>
    %cst_46 = arith.constant dense<0.000000e+00> : vector<16x32xf32>
    %117 = tpu.matmul %114, %116, %cst_46 {dimension_numbers = #tpu.dot_dimension_numbers<[1], [0], [0], [1], [0, 0, 1, 1], [], []>} : vector<16x32xbf16>, vector<32x32xbf16>, vector<16x32xf32> -> vector<16x32xf32>
    %118 = arith.addf %0, %117 : vector<16x32xf32>
    %c0_47 = arith.constant 0 : index
    %c0_48 = arith.constant 0 : index
    %c0_49 = arith.constant 0 : index
    %119 = vector.load %arg8[%c0_47, %c0_48, %c0_49] : memref<2x1x32xf32, #tpu.memory_space<vmem>>, vector<1x1x32xf32>
    %120 = vector.shape_cast %119 : vector<1x1x32xf32> to vector<1x32xf32>
    %121 = arith.mulf %118, %118 : vector<16x32xf32>
    %cst_50 = arith.constant dense<0.000000e+00> : vector<16xf32>
    %122 = vector.multi_reduction <add>, %121, %cst_50 [1] : vector<16x32xf32> to vector<16xf32>
    %123 = vector.shape_cast %122 : vector<16xf32> to vector<16x1xf32>
    %cst_51 = arith.constant 3.200000e+01 : f32
    %124 = vector.broadcast %cst_51 : f32 to vector<16x1xf32>
    %125 = arith.divf %123, %124 : vector<16x1xf32>
    %cst_52 = arith.constant 9.99999997E-7 : f32
    %126 = vector.broadcast %cst_52 : f32 to vector<16x1xf32>
    %127 = arith.addf %125, %126 : vector<16x1xf32>
    %128 = math.rsqrt %127 : vector<16x1xf32>
    %129 = vector.broadcast %128 : vector<16x1xf32> to vector<16x32xf32>
    %130 = arith.mulf %118, %129 : vector<16x32xf32>
    %131 = vector.broadcast %120 : vector<1x32xf32> to vector<16x32xf32>
    %132 = arith.mulf %130, %131 : vector<16x32xf32>
    %133 = arith.truncf %132 : vector<16x32xf32> to vector<16x32xbf16>
    %c0_53 = arith.constant 0 : index
    %c0_54 = arith.constant 0 : index
    %c0_55 = arith.constant 0 : index
    %134 = vector.load %arg9[%c0_53, %c0_54, %c0_55] : memref<2x32x128xbf16, #tpu.memory_space<vmem>>, vector<1x32x128xbf16>
    %135 = vector.shape_cast %134 : vector<1x32x128xbf16> to vector<32x128xbf16>
    %cst_56 = arith.constant dense<0.000000e+00> : vector<16x128xf32>
    %136 = tpu.matmul %133, %135, %cst_56 {dimension_numbers = #tpu.dot_dimension_numbers<[1], [0], [0], [1], [0, 0, 1, 1], [], []>} : vector<16x32xbf16>, vector<32x128xbf16>, vector<16x128xf32> -> vector<16x128xf32>
    %137 = vector.extract_strided_slice %136 {offsets = [0, 0], sizes = [16, 64], strides = [1, 1]} : vector<16x128xf32> to vector<16x64xf32>
    %138 = vector.extract_strided_slice %136 {offsets = [0, 64], sizes = [16, 64], strides = [1, 1]} : vector<16x128xf32> to vector<16x64xf32>
    %139 = arith.negf %137 : vector<16x64xf32>
    %140 = math.exp %139 : vector<16x64xf32>
    %cst_57 = arith.constant 1.000000e+00 : f32
    %141 = vector.broadcast %cst_57 : f32 to vector<16x64xf32>
    %142 = arith.addf %141, %140 : vector<16x64xf32>
    %143 = arith.divf %141, %142 : vector<16x64xf32>
    %144 = arith.mulf %137, %143 : vector<16x64xf32>
    %145 = arith.mulf %144, %138 : vector<16x64xf32>
    %146 = arith.truncf %145 : vector<16x64xf32> to vector<16x64xbf16>
    %c0_58 = arith.constant 0 : index
    %c0_59 = arith.constant 0 : index
    %c0_60 = arith.constant 0 : index
    %147 = vector.load %arg10[%c0_58, %c0_59, %c0_60] : memref<2x64x32xbf16, #tpu.memory_space<vmem>>, vector<1x64x32xbf16>
    %148 = vector.shape_cast %147 : vector<1x64x32xbf16> to vector<64x32xbf16>
    %cst_61 = arith.constant dense<0.000000e+00> : vector<16x32xf32>
    %149 = tpu.matmul %146, %148, %cst_61 {dimension_numbers = #tpu.dot_dimension_numbers<[1], [0], [0], [1], [0, 0, 1, 1], [], []>} : vector<16x64xbf16>, vector<64x32xbf16>, vector<16x32xf32> -> vector<16x32xf32>
    %150 = arith.addf %118, %149 : vector<16x32xf32>
    %c1 = arith.constant 1 : index
    %c0_62 = arith.constant 0 : index
    %c0_63 = arith.constant 0 : index
    %151 = vector.load %arg5[%c1, %c0_62, %c0_63] : memref<2x1x32xf32, #tpu.memory_space<vmem>>, vector<1x1x32xf32>
    %152 = vector.shape_cast %151 : vector<1x1x32xf32> to vector<1x32xf32>
    %153 = arith.mulf %150, %150 : vector<16x32xf32>
    %cst_64 = arith.constant dense<0.000000e+00> : vector<16xf32>
    %154 = vector.multi_reduction <add>, %153, %cst_64 [1] : vector<16x32xf32> to vector<16xf32>
    %155 = vector.shape_cast %154 : vector<16xf32> to vector<16x1xf32>
    %cst_65 = arith.constant 3.200000e+01 : f32
    %156 = vector.broadcast %cst_65 : f32 to vector<16x1xf32>
    %157 = arith.divf %155, %156 : vector<16x1xf32>
    %cst_66 = arith.constant 9.99999997E-7 : f32
    %158 = vector.broadcast %cst_66 : f32 to vector<16x1xf32>
    %159 = arith.addf %157, %158 : vector<16x1xf32>
    %160 = math.rsqrt %159 : vector<16x1xf32>
    %161 = vector.broadcast %160 : vector<16x1xf32> to vector<16x32xf32>
    %162 = arith.mulf %150, %161 : vector<16x32xf32>
    %163 = vector.broadcast %152 : vector<1x32xf32> to vector<16x32xf32>
    %164 = arith.mulf %162, %163 : vector<16x32xf32>
    %165 = arith.truncf %164 : vector<16x32xf32> to vector<16x32xbf16>
    %c1_67 = arith.constant 1 : index
    %c0_68 = arith.constant 0 : index
    %c0_69 = arith.constant 0 : index
    %166 = vector.load %arg6[%c1_67, %c0_68, %c0_69] : memref<2x32x160xbf16, #tpu.memory_space<vmem>>, vector<1x32x160xbf16>
    %167 = vector.shape_cast %166 : vector<1x32x160xbf16> to vector<32x160xbf16>
    %cst_70 = arith.constant dense<0.000000e+00> : vector<16x160xf32>
    %168 = tpu.matmul %165, %167, %cst_70 {dimension_numbers = #tpu.dot_dimension_numbers<[1], [0], [0], [1], [0, 0, 1, 1], [], []>} : vector<16x32xbf16>, vector<32x160xbf16>, vector<16x160xf32> -> vector<16x160xf32>
    %169 = vector.extract_strided_slice %168 {offsets = [0, 0], sizes = [16, 32], strides = [1, 1]} : vector<16x160xf32> to vector<16x32xf32>
    %170 = arith.mulf %169, %2 : vector<16x32xf32>
    %171 = vector.extract_strided_slice %168 {offsets = [0, 32], sizes = [16, 32], strides = [1, 1]} : vector<16x160xf32> to vector<16x32xf32>
    %172 = arith.mulf %171, %3 : vector<16x32xf32>
    %173 = arith.addf %170, %172 : vector<16x32xf32>
    %174 = vector.extract_strided_slice %168 {offsets = [0, 64], sizes = [16, 32], strides = [1, 1]} : vector<16x160xf32> to vector<16x32xf32>
    %175 = arith.mulf %174, %2 : vector<16x32xf32>
    %176 = vector.extract_strided_slice %168 {offsets = [0, 96], sizes = [16, 32], strides = [1, 1]} : vector<16x160xf32> to vector<16x32xf32>
    %177 = arith.mulf %176, %3 : vector<16x32xf32>
    %178 = arith.addf %175, %177 : vector<16x32xf32>
    %179 = vector.extract_strided_slice %168 {offsets = [0, 128], sizes = [16, 32], strides = [1, 1]} : vector<16x160xf32> to vector<16x32xf32>
    %180 = vector.extract_strided_slice %173 {offsets = [0, 0], sizes = [16, 8], strides = [1, 1]} : vector<16x32xf32> to vector<16x8xf32>
    %181 = vector.extract_strided_slice %178 {offsets = [0, 0], sizes = [16, 8], strides = [1, 1]} : vector<16x32xf32> to vector<16x8xf32>
    %182 = vector.extract_strided_slice %179 {offsets = [0, 0], sizes = [16, 8], strides = [1, 1]} : vector<16x32xf32> to vector<16x8xf32>
    %183 = tpu.transpose %181, [1, 0] : vector<16x8xf32> -> vector<8x16xf32>
    %cst_71 = arith.constant dense<0.000000e+00> : vector<16x16xf32>
    %184 = tpu.matmul %180, %183, %cst_71 {dimension_numbers = #tpu.dot_dimension_numbers<[1], [0], [0], [1], [0, 0, 1, 1], [], []>} : vector<16x8xf32>, vector<8x16xf32>, vector<16x16xf32> -> vector<16x16xf32>
    %cst_72 = arith.constant 0.353553385 : f32
    %185 = vector.broadcast %cst_72 : f32 to vector<16x16xf32>
    %186 = arith.mulf %184, %185 : vector<16x16xf32>
    %187 = arith.addf %186, %1 : vector<16x16xf32>
    %cst_73 = arith.constant dense<0xFF800000> : vector<16xf32>
    %188 = vector.multi_reduction <maximumf>, %187, %cst_73 [1] : vector<16x16xf32> to vector<16xf32>
    %189 = vector.shape_cast %188 : vector<16xf32> to vector<16x1xf32>
    %190 = vector.broadcast %189 : vector<16x1xf32> to vector<16x16xf32>
    %191 = arith.subf %187, %190 : vector<16x16xf32>
    %192 = math.exp %191 : vector<16x16xf32>
    %cst_74 = arith.constant dense<0.000000e+00> : vector<16xf32>
    %193 = vector.multi_reduction <add>, %192, %cst_74 [1] : vector<16x16xf32> to vector<16xf32>
    %194 = vector.shape_cast %193 : vector<16xf32> to vector<16x1xf32>
    %195 = tpu.reciprocal %194 {approx = true} : vector<16x1xf32> -> vector<16x1xf32>
    %196 = vector.broadcast %195 : vector<16x1xf32> to vector<16x16xf32>
    %197 = arith.mulf %192, %196 : vector<16x16xf32>
    %cst_75 = arith.constant dense<0.000000e+00> : vector<16x8xf32>
    %198 = tpu.matmul %197, %182, %cst_75 {dimension_numbers = #tpu.dot_dimension_numbers<[1], [0], [0], [1], [0, 0, 1, 1], [], []>} : vector<16x16xf32>, vector<16x8xf32>, vector<16x8xf32> -> vector<16x8xf32>
    %c0_76 = arith.constant 0 : index
    %c0_77 = arith.constant 0 : index
    %199 = vector.load %arg14[%c0_76, %c0_77] : memref<16x32xf32, #tpu.memory_space<vmem>>, vector<16x8xf32>
    tpu.vector_store %arg14[%c0_76, %c0_77], %198 {strides = array<i32>} : memref<16x32xf32, #tpu.memory_space<vmem>>, vector<16x8xf32>,
    %200 = vector.extract_strided_slice %173 {offsets = [0, 8], sizes = [16, 8], strides = [1, 1]} : vector<16x32xf32> to vector<16x8xf32>
    %201 = vector.extract_strided_slice %178 {offsets = [0, 8], sizes = [16, 8], strides = [1, 1]} : vector<16x32xf32> to vector<16x8xf32>
    %202 = vector.extract_strided_slice %179 {offsets = [0, 8], sizes = [16, 8], strides = [1, 1]} : vector<16x32xf32> to vector<16x8xf32>
    %203 = tpu.transpose %201, [1, 0] : vector<16x8xf32> -> vector<8x16xf32>
    %cst_78 = arith.constant dense<0.000000e+00> : vector<16x16xf32>
    %204 = tpu.matmul %200, %203, %cst_78 {dimension_numbers = #tpu.dot_dimension_numbers<[1], [0], [0], [1], [0, 0, 1, 1], [], []>} : vector<16x8xf32>, vector<8x16xf32>, vector<16x16xf32> -> vector<16x16xf32>
    %cst_79 = arith.constant 0.353553385 : f32
    %205 = vector.broadcast %cst_79 : f32 to vector<16x16xf32>
    %206 = arith.mulf %204, %205 : vector<16x16xf32>
    %207 = arith.addf %206, %1 : vector<16x16xf32>
    %cst_80 = arith.constant dense<0xFF800000> : vector<16xf32>
    %208 = vector.multi_reduction <maximumf>, %207, %cst_80 [1] : vector<16x16xf32> to vector<16xf32>
    %209 = vector.shape_cast %208 : vector<16xf32> to vector<16x1xf32>
    %210 = vector.broadcast %209 : vector<16x1xf32> to vector<16x16xf32>
    %211 = arith.subf %207, %210 : vector<16x16xf32>
    %212 = math.exp %211 : vector<16x16xf32>
    %cst_81 = arith.constant dense<0.000000e+00> : vector<16xf32>
    %213 = vector.multi_reduction <add>, %212, %cst_81 [1] : vector<16x16xf32> to vector<16xf32>
    %214 = vector.shape_cast %213 : vector<16xf32> to vector<16x1xf32>
    %215 = tpu.reciprocal %214 {approx = true} : vector<16x1xf32> -> vector<16x1xf32>
    %216 = vector.broadcast %215 : vector<16x1xf32> to vector<16x16xf32>
    %217 = arith.mulf %212, %216 : vector<16x16xf32>
    %cst_82 = arith.constant dense<0.000000e+00> : vector<16x8xf32>
    %218 = tpu.matmul %217, %202, %cst_82 {dimension_numbers = #tpu.dot_dimension_numbers<[1], [0], [0], [1], [0, 0, 1, 1], [], []>} : vector<16x16xf32>, vector<16x8xf32>, vector<16x8xf32> -> vector<16x8xf32>
    %c0_83 = arith.constant 0 : index
    %c8_84 = arith.constant 8 : index
    %219 = vector.load %arg14[%c0_83, %c8_84] : memref<16x32xf32, #tpu.memory_space<vmem>>, vector<16x8xf32>
    tpu.vector_store %arg14[%c0_83, %c8_84], %218 {strides = array<i32>} : memref<16x32xf32, #tpu.memory_space<vmem>>, vector<16x8xf32>,
    %220 = vector.extract_strided_slice %173 {offsets = [0, 16], sizes = [16, 8], strides = [1, 1]} : vector<16x32xf32> to vector<16x8xf32>
    %221 = vector.extract_strided_slice %178 {offsets = [0, 16], sizes = [16, 8], strides = [1, 1]} : vector<16x32xf32> to vector<16x8xf32>
    %222 = vector.extract_strided_slice %179 {offsets = [0, 16], sizes = [16, 8], strides = [1, 1]} : vector<16x32xf32> to vector<16x8xf32>
    %223 = tpu.transpose %221, [1, 0] : vector<16x8xf32> -> vector<8x16xf32>
    %cst_85 = arith.constant dense<0.000000e+00> : vector<16x16xf32>
    %224 = tpu.matmul %220, %223, %cst_85 {dimension_numbers = #tpu.dot_dimension_numbers<[1], [0], [0], [1], [0, 0, 1, 1], [], []>} : vector<16x8xf32>, vector<8x16xf32>, vector<16x16xf32> -> vector<16x16xf32>
    %cst_86 = arith.constant 0.353553385 : f32
    %225 = vector.broadcast %cst_86 : f32 to vector<16x16xf32>
    %226 = arith.mulf %224, %225 : vector<16x16xf32>
    %227 = arith.addf %226, %1 : vector<16x16xf32>
    %cst_87 = arith.constant dense<0xFF800000> : vector<16xf32>
    %228 = vector.multi_reduction <maximumf>, %227, %cst_87 [1] : vector<16x16xf32> to vector<16xf32>
    %229 = vector.shape_cast %228 : vector<16xf32> to vector<16x1xf32>
    %230 = vector.broadcast %229 : vector<16x1xf32> to vector<16x16xf32>
    %231 = arith.subf %227, %230 : vector<16x16xf32>
    %232 = math.exp %231 : vector<16x16xf32>
    %cst_88 = arith.constant dense<0.000000e+00> : vector<16xf32>
    %233 = vector.multi_reduction <add>, %232, %cst_88 [1] : vector<16x16xf32> to vector<16xf32>
    %234 = vector.shape_cast %233 : vector<16xf32> to vector<16x1xf32>
    %235 = tpu.reciprocal %234 {approx = true} : vector<16x1xf32> -> vector<16x1xf32>
    %236 = vector.broadcast %235 : vector<16x1xf32> to vector<16x16xf32>
    %237 = arith.mulf %232, %236 : vector<16x16xf32>
    %cst_89 = arith.constant dense<0.000000e+00> : vector<16x8xf32>
    %238 = tpu.matmul %237, %222, %cst_89 {dimension_numbers = #tpu.dot_dimension_numbers<[1], [0], [0], [1], [0, 0, 1, 1], [], []>} : vector<16x16xf32>, vector<16x8xf32>, vector<16x8xf32> -> vector<16x8xf32>
    %c0_90 = arith.constant 0 : index
    %c16_91 = arith.constant 16 : index
    %239 = vector.load %arg14[%c0_90, %c16_91] : memref<16x32xf32, #tpu.memory_space<vmem>>, vector<16x8xf32>
    tpu.vector_store %arg14[%c0_90, %c16_91], %238 {strides = array<i32>} : memref<16x32xf32, #tpu.memory_space<vmem>>, vector<16x8xf32>,
    %240 = vector.extract_strided_slice %173 {offsets = [0, 24], sizes = [16, 8], strides = [1, 1]} : vector<16x32xf32> to vector<16x8xf32>
    %241 = vector.extract_strided_slice %178 {offsets = [0, 24], sizes = [16, 8], strides = [1, 1]} : vector<16x32xf32> to vector<16x8xf32>
    %242 = vector.extract_strided_slice %179 {offsets = [0, 24], sizes = [16, 8], strides = [1, 1]} : vector<16x32xf32> to vector<16x8xf32>
    %243 = tpu.transpose %241, [1, 0] : vector<16x8xf32> -> vector<8x16xf32>
    %cst_92 = arith.constant dense<0.000000e+00> : vector<16x16xf32>
    %244 = tpu.matmul %240, %243, %cst_92 {dimension_numbers = #tpu.dot_dimension_numbers<[1], [0], [0], [1], [0, 0, 1, 1], [], []>} : vector<16x8xf32>, vector<8x16xf32>, vector<16x16xf32> -> vector<16x16xf32>
    %cst_93 = arith.constant 0.353553385 : f32
    %245 = vector.broadcast %cst_93 : f32 to vector<16x16xf32>
    %246 = arith.mulf %244, %245 : vector<16x16xf32>
    %247 = arith.addf %246, %1 : vector<16x16xf32>
    %cst_94 = arith.constant dense<0xFF800000> : vector<16xf32>
    %248 = vector.multi_reduction <maximumf>, %247, %cst_94 [1] : vector<16x16xf32> to vector<16xf32>
    %249 = vector.shape_cast %248 : vector<16xf32> to vector<16x1xf32>
    %250 = vector.broadcast %249 : vector<16x1xf32> to vector<16x16xf32>
    %251 = arith.subf %247, %250 : vector<16x16xf32>
    %252 = math.exp %251 : vector<16x16xf32>
    %cst_95 = arith.constant dense<0.000000e+00> : vector<16xf32>
    %253 = vector.multi_reduction <add>, %252, %cst_95 [1] : vector<16x16xf32> to vector<16xf32>
    %254 = vector.shape_cast %253 : vector<16xf32> to vector<16x1xf32>
    %255 = tpu.reciprocal %254 {approx = true} : vector<16x1xf32> -> vector<16x1xf32>
    %256 = vector.broadcast %255 : vector<16x1xf32> to vector<16x16xf32>
    %257 = arith.mulf %252, %256 : vector<16x16xf32>
    %cst_96 = arith.constant dense<0.000000e+00> : vector<16x8xf32>
    %258 = tpu.matmul %257, %242, %cst_96 {dimension_numbers = #tpu.dot_dimension_numbers<[1], [0], [0], [1], [0, 0, 1, 1], [], []>} : vector<16x16xf32>, vector<16x8xf32>, vector<16x8xf32> -> vector<16x8xf32>
    %c0_97 = arith.constant 0 : index
    %c24_98 = arith.constant 24 : index
    %259 = vector.load %arg14[%c0_97, %c24_98] : memref<16x32xf32, #tpu.memory_space<vmem>>, vector<16x8xf32>
    tpu.vector_store %arg14[%c0_97, %c24_98], %258 {strides = array<i32>} : memref<16x32xf32, #tpu.memory_space<vmem>>, vector<16x8xf32>,
    %c0_99 = arith.constant 0 : index
    %c0_100 = arith.constant 0 : index
    %260 = vector.load %arg14[%c0_99, %c0_100] : memref<16x32xf32, #tpu.memory_space<vmem>>, vector<16x32xf32>
    %261 = arith.truncf %260 : vector<16x32xf32> to vector<16x32xbf16>
    %c1_101 = arith.constant 1 : index
    %c0_102 = arith.constant 0 : index
    %c0_103 = arith.constant 0 : index
    %262 = vector.load %arg7[%c1_101, %c0_102, %c0_103] : memref<2x32x32xbf16, #tpu.memory_space<vmem>>, vector<1x32x32xbf16>
    %263 = vector.shape_cast %262 : vector<1x32x32xbf16> to vector<32x32xbf16>
    %cst_104 = arith.constant dense<0.000000e+00> : vector<16x32xf32>
    %264 = tpu.matmul %261, %263, %cst_104 {dimension_numbers = #tpu.dot_dimension_numbers<[1], [0], [0], [1], [0, 0, 1, 1], [], []>} : vector<16x32xbf16>, vector<32x32xbf16>, vector<16x32xf32> -> vector<16x32xf32>
    %265 = arith.addf %150, %264 : vector<16x32xf32>
    %c1_105 = arith.constant 1 : index
    %c0_106 = arith.constant 0 : index
    %c0_107 = arith.constant 0 : index
    %266 = vector.load %arg8[%c1_105, %c0_106, %c0_107] : memref<2x1x32xf32, #tpu.memory_space<vmem>>, vector<1x1x32xf32>
    %267 = vector.shape_cast %266 : vector<1x1x32xf32> to vector<1x32xf32>
    %268 = arith.mulf %265, %265 : vector<16x32xf32>
    %cst_108 = arith.constant dense<0.000000e+00> : vector<16xf32>
    %269 = vector.multi_reduction <add>, %268, %cst_108 [1] : vector<16x32xf32> to vector<16xf32>
    %270 = vector.shape_cast %269 : vector<16xf32> to vector<16x1xf32>
    %cst_109 = arith.constant 3.200000e+01 : f32
    %271 = vector.broadcast %cst_109 : f32 to vector<16x1xf32>
    %272 = arith.divf %270, %271 : vector<16x1xf32>
    %cst_110 = arith.constant 9.99999997E-7 : f32
    %273 = vector.broadcast %cst_110 : f32 to vector<16x1xf32>
    %274 = arith.addf %272, %273 : vector<16x1xf32>
    %275 = math.rsqrt %274 : vector<16x1xf32>
    %276 = vector.broadcast %275 : vector<16x1xf32> to vector<16x32xf32>
    %277 = arith.mulf %265, %276 : vector<16x32xf32>
    %278 = vector.broadcast %267 : vector<1x32xf32> to vector<16x32xf32>
    %279 = arith.mulf %277, %278 : vector<16x32xf32>
    %280 = arith.truncf %279 : vector<16x32xf32> to vector<16x32xbf16>
    %c1_111 = arith.constant 1 : index
    %c0_112 = arith.constant 0 : index
    %c0_113 = arith.constant 0 : index
    %281 = vector.load %arg9[%c1_111, %c0_112, %c0_113] : memref<2x32x128xbf16, #tpu.memory_space<vmem>>, vector<1x32x128xbf16>
    %282 = vector.shape_cast %281 : vector<1x32x128xbf16> to vector<32x128xbf16>
    %cst_114 = arith.constant dense<0.000000e+00> : vector<16x128xf32>
    %283 = tpu.matmul %280, %282, %cst_114 {dimension_numbers = #tpu.dot_dimension_numbers<[1], [0], [0], [1], [0, 0, 1, 1], [], []>} : vector<16x32xbf16>, vector<32x128xbf16>, vector<16x128xf32> -> vector<16x128xf32>
    %284 = vector.extract_strided_slice %283 {offsets = [0, 0], sizes = [16, 64], strides = [1, 1]} : vector<16x128xf32> to vector<16x64xf32>
    %285 = vector.extract_strided_slice %283 {offsets = [0, 64], sizes = [16, 64], strides = [1, 1]} : vector<16x128xf32> to vector<16x64xf32>
    %286 = arith.negf %284 : vector<16x64xf32>
    %287 = math.exp %286 : vector<16x64xf32>
    %cst_115 = arith.constant 1.000000e+00 : f32
    %288 = vector.broadcast %cst_115 : f32 to vector<16x64xf32>
    %289 = arith.addf %288, %287 : vector<16x64xf32>
    %290 = arith.divf %288, %289 : vector<16x64xf32>
    %291 = arith.mulf %284, %290 : vector<16x64xf32>
    %292 = arith.mulf %291, %285 : vector<16x64xf32>
    %293 = arith.truncf %292 : vector<16x64xf32> to vector<16x64xbf16>
    %c1_116 = arith.constant 1 : index
    %c0_117 = arith.constant 0 : index
    %c0_118 = arith.constant 0 : index
    %294 = vector.load %arg10[%c1_116, %c0_117, %c0_118] : memref<2x64x32xbf16, #tpu.memory_space<vmem>>, vector<1x64x32xbf16>
    %295 = vector.shape_cast %294 : vector<1x64x32xbf16> to vector<64x32xbf16>
    %cst_119 = arith.constant dense<0.000000e+00> : vector<16x32xf32>
    %296 = tpu.matmul %293, %295, %cst_119 {dimension_numbers = #tpu.dot_dimension_numbers<[1], [0], [0], [1], [0, 0, 1, 1], [], []>} : vector<16x64xbf16>, vector<64x32xbf16>, vector<16x32xf32> -> vector<16x32xf32>
    %297 = arith.addf %265, %296 : vector<16x32xf32>
    %c0_120 = arith.constant 0 : index
    %c0_121 = arith.constant 0 : index
    %298 = vector.load %arg11[%c0_120, %c0_121] : memref<1x32xf32, #tpu.memory_space<vmem>>, vector<1x32xf32>
    %299 = arith.mulf %297, %297 : vector<16x32xf32>
    %cst_122 = arith.constant dense<0.000000e+00> : vector<16xf32>
    %300 = vector.multi_reduction <add>, %299, %cst_122 [1] : vector<16x32xf32> to vector<16xf32>
    %301 = vector.shape_cast %300 : vector<16xf32> to vector<16x1xf32>
    %cst_123 = arith.constant 3.200000e+01 : f32
    %302 = vector.broadcast %cst_123 : f32 to vector<16x1xf32>
    %303 = arith.divf %301, %302 : vector<16x1xf32>
    %cst_124 = arith.constant 9.99999997E-7 : f32
    %304 = vector.broadcast %cst_124 : f32 to vector<16x1xf32>
    %305 = arith.addf %303, %304 : vector<16x1xf32>
    %306 = math.rsqrt %305 : vector<16x1xf32>
    %307 = vector.broadcast %306 : vector<16x1xf32> to vector<16x32xf32>
    %308 = arith.mulf %297, %307 : vector<16x32xf32>
    %309 = vector.broadcast %298 : vector<1x32xf32> to vector<16x32xf32>
    %310 = arith.mulf %308, %309 : vector<16x32xf32>
    %c0_125 = arith.constant 0 : index
    %c0_126 = arith.constant 0 : index
    %311 = vector.load %arg12[%c0_125, %c0_126] : memref<32x256xf32, #tpu.memory_space<vmem>>, vector<32x256xf32>
    %cst_127 = arith.constant dense<0.000000e+00> : vector<16x256xf32>
    %312 = tpu.matmul %310, %311, %cst_127 {dimension_numbers = #tpu.dot_dimension_numbers<[1], [0], [0], [1], [0, 0, 1, 1], [], []>} : vector<16x32xf32>, vector<32x256xf32>, vector<16x256xf32> -> vector<16x256xf32>
    %c0_128 = arith.constant 0 : index
    %c0_129 = arith.constant 0 : index
    %313 = vector.load %arg13[%c0_128, %c0_129] : memref<16x256xf32, #tpu.memory_space<vmem>>, vector<16x256xf32>
    tpu.vector_store %arg13[%c0_128, %c0_129], %312 {strides = array<i32>} : memref<16x256xf32, #tpu.memory_space<vmem>>, vector<16x256xf32>,
    return
  }
  func.func @transform_0(%arg0: i32) -> (i32, i32) {
    %c0_i32 = arith.constant 0 : i32
    %c0_i32_0 = arith.constant 0 : i32
    %c0_i32_1 = arith.constant 0 : i32
    return %c0_i32, %c0_i32_0 : i32, i32
  }
  func.func @transform_1(%arg0: i32) -> (i32, i32) {
    %c0_i32 = arith.constant 0 : i32
    %c0_i32_0 = arith.constant 0 : i32
    %c0_i32_1 = arith.constant 0 : i32
    return %c0_i32, %c0_i32_0 : i32, i32
  }
  func.func @transform_2(%arg0: i32) -> (i32, i32) {
    %c0_i32 = arith.constant 0 : i32
    %c0_i32_0 = arith.constant 0 : i32
    %c0_i32_1 = arith.constant 0 : i32
    return %c0_i32, %c0_i32_0 : i32, i32
  }
  func.func @transform_3(%arg0: i32) -> (i32, i32) {
    %c0_i32 = arith.constant 0 : i32
    %c0_i32_0 = arith.constant 0 : i32
    %c0_i32_1 = arith.constant 0 : i32
    return %c0_i32, %c0_i32_0 : i32, i32
  }
  func.func @transform_4(%arg0: i32) -> (i32, i32, i32) {
    %c0_i32 = arith.constant 0 : i32
    %c0_i32_0 = arith.constant 0 : i32
    %c0_i32_1 = arith.constant 0 : i32
    %c0_i32_2 = arith.constant 0 : i32
    return %c0_i32, %c0_i32_0, %c0_i32_1 : i32, i32, i32
  }
  func.func @transform_5(%arg0: i32) -> (i32, i32, i32) {
    %c0_i32 = arith.constant 0 : i32
    %c0_i32_0 = arith.constant 0 : i32
    %c0_i32_1 = arith.constant 0 : i32
    %c0_i32_2 = arith.constant 0 : i32
    return %c0_i32, %c0_i32_0, %c0_i32_1 : i32, i32, i32
  }
  func.func @transform_6(%arg0: i32) -> (i32, i32, i32) {
    %c0_i32 = arith.constant 0 : i32
    %c0_i32_0 = arith.constant 0 : i32
    %c0_i32_1 = arith.constant 0 : i32
    %c0_i32_2 = arith.constant 0 : i32
    return %c0_i32, %c0_i32_0, %c0_i32_1 : i32, i32, i32
  }
  func.func @transform_7(%arg0: i32) -> (i32, i32, i32) {
    %c0_i32 = arith.constant 0 : i32
    %c0_i32_0 = arith.constant 0 : i32
    %c0_i32_1 = arith.constant 0 : i32
    %c0_i32_2 = arith.constant 0 : i32
    return %c0_i32, %c0_i32_0, %c0_i32_1 : i32, i32, i32
  }
  func.func @transform_8(%arg0: i32) -> (i32, i32, i32) {
    %c0_i32 = arith.constant 0 : i32
    %c0_i32_0 = arith.constant 0 : i32
    %c0_i32_1 = arith.constant 0 : i32
    %c0_i32_2 = arith.constant 0 : i32
    return %c0_i32, %c0_i32_0, %c0_i32_1 : i32, i32, i32
  }
  func.func @transform_9(%arg0: i32) -> (i32, i32, i32) {
    %c0_i32 = arith.constant 0 : i32
    %c0_i32_0 = arith.constant 0 : i32
    %c0_i32_1 = arith.constant 0 : i32
    %c0_i32_2 = arith.constant 0 : i32
    return %c0_i32, %c0_i32_0, %c0_i32_1 : i32, i32, i32
  }
  func.func @transform_10(%arg0: i32) -> (i32, i32) {
    %c0_i32 = arith.constant 0 : i32
    %c0_i32_0 = arith.constant 0 : i32
    %c0_i32_1 = arith.constant 0 : i32
    return %c0_i32, %c0_i32_0 : i32, i32
  }
  func.func @transform_11(%arg0: i32) -> (i32, i32) {
    %c0_i32 = arith.constant 0 : i32
    %c0_i32_0 = arith.constant 0 : i32
    %c0_i32_1 = arith.constant 0 : i32
    return %c0_i32, %c0_i32_0 : i32, i32
  }
  func.func @transform_12(%arg0: i32) -> (i32, i32) {
    %c0_i32 = arith.constant 0 : i32
    %c0_i32_0 = arith.constant 0 : i32
    %c0_i32_1 = arith.constant 0 : i32
    return %c0_i32, %c0_i32_0 : i32, i32
  }
}

</mosaic_0001>

<bundles_post_ra>
// kernel: tile.13
= control target key start
LH: loop header
LB: loop body
LE: loop exit
PB: predicated region body
PF: predicated region fallthrough
CT: control target
= control target key end

     0   :  { %s154_s0 = inlined_call_operand.vmem [shape: f32[8,8], index: 0, kind: input, shape index: {}]   ;;  %s155_s1 = inlined_call_operand.vmem [shape: f32[2,8,4,8], index: 1, kind: output, shape index: {}]  }
   0x1   :  { %v4_v0 = vld [vmem:[%s154_s0] ss:$0 sm:$0xff]  ;;  %v51_v1 = vld [vmem:[%s154_s0 + $0x1] ss:$0 sm:$0xff]  ;;  %v54_v2 = vld [vmem:[%s154_s0 + $0x2] ss:$0 sm:$0xff] }
   0x2   :  { %5 = vst [vmem:[%s155_s1] sm:$0xf] %v4_v0  ;;  %50 = vst [vmem:[%s155_s1 + $0x20] sm:$0xf] %v4_v0  ;;  %v57_v3 = vld [vmem:[%s154_s0 + $0x3] ss:$0 sm:$0xff] }
   0x3   :  { %52 = vst [vmem:[%s155_s1 + $0x4] sm:$0xf] %v51_v1  ;;  %53 = vst [vmem:[%s155_s1 + $0x24] sm:$0xf] %v51_v1  ;;  %v60_v4 = vld [vmem:[%s154_s0 + $0x4] ss:$0 sm:$0xff] }
   0x4   :  { %55 = vst [vmem:[%s155_s1 + $0x8] sm:$0xf] %v54_v2  ;;  %56 = vst [vmem:[%s155_s1 + $0x28] sm:$0xf] %v54_v2  ;;  %v63_v5 = vld [vmem:[%s154_s0 + $0x5] ss:$0 sm:$0xff] }
   0x5   :  { %58 = vst [vmem:[%s155_s1 + $0xc] sm:$0xf] %v57_v3  ;;  %59 = vst [vmem:[%s155_s1 + $0x2c] sm:$0xf] %v57_v3  ;;  %v66_v6 = vld [vmem:[%s154_s0 + $0x6] ss:$0 sm:$0xff] }
   0x6   :  { %61 = vst [vmem:[%s155_s1 + $0x10] sm:$0xf] %v60_v4  ;;  %62 = vst [vmem:[%s155_s1 + $0x30] sm:$0xf] %v60_v4  ;;  %v69_v7 = vld [vmem:[%s154_s0 + $0x7] ss:$0 sm:$0xff] }
   0x7   :  { %64 = vst [vmem:[%s155_s1 + $0x14] sm:$0xf] %v63_v5  ;;  %65 = vst [vmem:[%s155_s1 + $0x34] sm:$0xf] %v63_v5 }
   0x8   :  { %67 = vst [vmem:[%s155_s1 + $0x18] sm:$0xf] %v66_v6  ;;  %68 = vst [vmem:[%s155_s1 + $0x38] sm:$0xf] %v66_v6 }
   0x9   :  { %70 = vst [vmem:[%s155_s1 + $0x1c] sm:$0xf] %v69_v7  ;;  %71 = vst [vmem:[%s155_s1 + $0x3c] sm:$0xf] %v69_v7 }

// kernel: tile.14
= control target key start
LH: loop header
LB: loop body
LE: loop exit
PB: predicated region body
PF: predicated region fallthrough
CT: control target
= control target key end

     0   :  { %vm82_vm0 = vcmask 1047556   ;;  %vm84_vm1 = vcmask 64512   ;;  %s195_s9 = smov 24   ;;  %s196_s14 = smov 8   ;;  %vm103_vm2 = vcmask 261312   ;;  %vm124_vm3 = vcmask 195712   ;;  %s289_s0 = inlined_call_operand.vmem [shape: f32[2,8,4,8], index: 0, kind: input, shape index: {}]   ;;  %s290_s1 = inlined_call_operand.vmem [shape: f32[16,32], index: 1, kind: output, shape index: {}]  }
   0x1   :  { %v180_v0 = vld [vmem:[%s289_s0 + $0x1c] sm:$0xf]  ;;  %v181_v1 = vld [vmem:[%s289_s0 + $0x18] sm:$0xf]  ;;  %v182_v2 = vld [vmem:[%s289_s0 + $0x14] sm:$0xf] }
   0x2   :  { %48 = vst [vmem:[#allocation0 + $0x38] sm:$0xf] %v180_v0  ;;  %53 = vst [vmem:[#allocation0 + $0x30] sm:$0xf] %v181_v1  ;;  %v183_v3 = vld [vmem:[%s289_s0 + $0x10] sm:$0xf] }
   0x3   :  { %58 = vst [vmem:[#allocation0 + $0x28] sm:$0xf] %v182_v2  ;;  %v184_v4 = vld [vmem:[%s289_s0 + $0xc] sm:$0xf]  ;;  %v185_v5 = vld [vmem:[%s289_s0 + $0x8] sm:$0xf] }
   0x4   :  { %63 = vst [vmem:[#allocation0 + $0x20] sm:$0xf] %v183_v3  ;;  %68 = vst [vmem:[#allocation0 + $0x18] sm:$0xf] %v184_v4  ;;  %v186_v6 = vld [vmem:[%s289_s0 + $0x4] sm:$0xf] }
   0x5   :  { %73 = vst [vmem:[#allocation0 + $0x10] sm:$0xf] %v185_v5  ;;  %v78_v7 = vld [vmem:[%s289_s0] sm:$0xf]  ;;  %77 = vst [vmem:[#allocation0 + $0x8] sm:$0xf] %v186_v6 }
   0x6   :  { %79 = vst [vmem:[#allocation0] sm:$0xf] %v78_v7  ;;  %v172_v8 = vld [vmem:[%s289_s0 + $0x3c] sm:$0xf]  ;;  %v173_v9 = vld [vmem:[%s289_s0 + $0x38] sm:$0xf] }
   0x7   :  { %8 = vst [vmem:[#allocation0 + $0x78] sm:$0xf] %v172_v8  ;;  %13 = vst [vmem:[#allocation0 + $0x70] sm:$0xf] %v173_v9  ;;  %v174_v10 = vld [vmem:[%s289_s0 + $0x34] sm:$0xf] }
   0x8   :  { %v175_v11 = vld [vmem:[%s289_s0 + $0x30] sm:$0xf]  ;;  %v176_v12 = vld [vmem:[%s289_s0 + $0x2c] sm:$0xf]  ;;  %18 = vst [vmem:[#allocation0 + $0x68] sm:$0xf] %v174_v10 }
   0x9   :  { %23 = vst [vmem:[#allocation0 + $0x60] sm:$0xf] %v175_v11  ;;  %28 = vst [vmem:[#allocation0 + $0x58] sm:$0xf] %v176_v12  ;;  %v177_v13 = vld [vmem:[%s289_s0 + $0x28] sm:$0xf] }
   0xa   :  { %v178_v14 = vld [vmem:[%s289_s0 + $0x24] sm:$0xf]  ;;  %v179_v15 = vld [vmem:[%s289_s0 + $0x20] sm:$0xf]  ;;  %33 = vst [vmem:[#allocation0 + $0x50] sm:$0xf] %v177_v13 }
   0xb   :  { %38 = vst [vmem:[#allocation0 + $0x48] sm:$0xf] %v178_v14  ;;  %43 = vst [vmem:[#allocation0 + $0x40] sm:$0xf] %v179_v15  ;;  %s194_s0 = smov 16   ;;  %vm145_vm4 = vcmask 130112  }
   0xc   :  { %v119_v16 = vld [vmem:[#allocation0 + $0x2] ss:$8 sm:$0xf0]   ;;  %v98_v17 = vld [vmem:[#allocation0 + $0x3] ss:$8 sm:$0xf0]  }
   0xd   :  { %v117_v18 = vld [vmem:[#allocation0 + $0x2] ss:$8 sm:$0xf]   ;;  %v96_v19 = vld [vmem:[#allocation0 + $0x3] ss:$8 sm:$0xf]  }
   0xe   :  { %v121_v20 = vsel %vm82_vm0, %v119_v16, %v117_v18  ;;  %v100_v21 = vsel %vm82_vm0, %v98_v17, %v96_v19  ;;  %v138_v24 = vld [vmem:[#allocation0 + $0x1] ss:$8 sm:$0xf]   ;;  %v80_v32 = vld [vmem:[#allocation0] ss:$8 sm:$0xf]  }
   0xf   :  { %122 = vrot.lane.b32.xlu1 %v121_v20, %s194_s0  ;;  %101 = vrot.lane.b32.xlu0 %v100_v21, %s195_s9  ;;  %v140_v25 = vld [vmem:[#allocation0 + $0x1] ss:$8 sm:$0xf0]   ;;  %v81_v33 = vld [vmem:[#allocation0] ss:$8 sm:$0xf0]  }
  0x10   :  { %v129_v22 = vld [vmem:[#allocation0 + $0x42] ss:$8 sm:$0xf0]   ;;  %v108_v23 = vld [vmem:[#allocation0 + $0x43] ss:$8 sm:$0xf0]   ;;  %v83_v34 = vsel %vm82_vm0, %v81_v33, %v80_v32  ;;  %v142_v38 = vsel %vm82_vm0, %v140_v25, %v138_v24 }
  0x11   :  { %v150_v31 = vld [vmem:[#allocation0 + $0x41] ss:$8 sm:$0xf0]   ;;  %v89_v36 = vld [vmem:[#allocation0 + $0x40] ss:$8 sm:$0xf0]  }
  0x12   :  { %v127_v26 = vld [vmem:[#allocation0 + $0x42] ss:$8 sm:$0xf]   ;;  %v106_v27 = vld [vmem:[#allocation0 + $0x43] ss:$8 sm:$0xf]  }
  0x13   :  { %v131_v28 = vsel %vm82_vm0, %v129_v22, %v127_v26  ;;  %v110_v29 = vsel %vm82_vm0, %v108_v23, %v106_v27  ;;  %v148_v30 = vld [vmem:[#allocation0 + $0x41] ss:$8 sm:$0xf]   ;;  %v87_v35 = vld [vmem:[#allocation0 + $0x40] ss:$8 sm:$0xf]  }
  0x14   :  { %132 = vrot.lane.b32.xlu1 %v131_v28, %s194_s0  ;;  %111 = vrot.lane.b32.xlu0 %v110_v29, %s195_s9  ;;  %v152_v37 = vsel %vm82_vm0, %v150_v31, %v148_v30  ;;  %85 = vst.msk [vmem:[%s290_s1] sm:$0xff] %vm84_vm1, %v83_v34   ;;  %v91_v39 = vsel %vm82_vm0, %v89_v36, %v87_v35 }
  0x15   :  { %187 = vst.msk [vmem:[%s290_s1 + $0x8] sm:$0xff] %vm84_vm1, %v91_v39  }
  0x18   :  { %153 = vrot.lane.b32.xlu1 %v152_v37, %s196_s14  ;;  %143 = vrot.lane.b32.xlu0 %v142_v38, %s196_s14 }
  0x81   :  { %v123_v40 = vpop.permute.xlu1 %122   ;;  %v102_v41 = vpop.permute.xlu0 %101  }
  0x82   :  { %104 = vst.msk [vmem:[%s290_s1] sm:$0xff] %vm103_vm2, %v102_v41  }
  0x83   :  { %125 = vst.msk [vmem:[%s290_s1] sm:$0xff] %vm124_vm3, %v123_v40  }
  0x86   :  { %v133_v42 = vpop.permute.xlu1 %132   ;;  %v112_v43 = vpop.permute.xlu0 %111  }
  0x87   :  { %188 = vst.msk [vmem:[%s290_s1 + $0x8] sm:$0xff] %vm103_vm2, %v112_v43  }
  0x88   :  { %189 = vst.msk [vmem:[%s290_s1 + $0x8] sm:$0xff] %vm124_vm3, %v133_v42  }
  0x8a   :  { %v154_v44 = vpop.permute.xlu1 %153   ;;  %v144_v45 = vpop.permute.xlu0 %143  }
  0x8b   :  { %190 = vst.msk [vmem:[%s290_s1 + $0x8] sm:$0xff] %vm145_vm4, %v154_v44   ;;  %146 = vst.msk [vmem:[%s290_s1] sm:$0xff] %vm145_vm4, %v144_v45  }

// kernel: language_model_forward.1
= control target key start
LH: loop header
LB: loop body
LE: loop exit
PB: predicated region body
PF: predicated region fallthrough
CT: control target
= control target key end

     0   :  { %vm53_vm0 = vcmask 261120   ;;  %v3324_v7 = vmov 0   ;;  %s3325_s16 = smov 96   ;;  %s3326_s17 = smov 32   ;;  %vm204_vm1 = vcmask 64512   ;;  %vm294_vm3 = vcmask 130048   ;;  %s3927_s0 = inlined_call_operand.vmem [shape: f32[16,32], index: 0, kind: input, shape index: {}]   ;;  %s3928_s5 = inlined_call_operand.vmem [shape: bf16[2,32,160], index: 5, kind: input, shape index: {}]   ;;  %s3929_s3 = inlined_call_operand.vmem [shape: f32[16,32], index: 3, kind: input, shape index: {}]   ;;  %s3930_s2 = inlined_call_operand.vmem [shape: f32[16,32], index: 2, kind: input, shape index: {}]   ;;  %s3931_s4 = inlined_call_operand.vmem [shape: f32[2,1,32], index: 4, kind: input, shape index: {}]   ;;  %s3932_s1 = inlined_call_operand.vmem [shape: f32[16,16], index: 1, kind: input, shape index: {}]   ;;  %s3933_s6 = inlined_call_operand.vmem [shape: bf16[2,32,32], index: 6, kind: input, shape index: {}]   ;;  %s3934_s8 = inlined_call_operand.vmem [shape: bf16[2,32,128], index: 8, kind: input, shape index: {}]   ;;  %s3935_s7 = inlined_call_operand.vmem [shape: f32[2,1,32], index: 7, kind: input, shape index: {}]   ;;  %s3936_s9 = inlined_call_operand.vmem [shape: bf16[2,64,32], index: 9, kind: input, shape index: {}]   ;;  %s3937_s11 = inlined_call_operand.vmem [shape: f32[32,256], index: 11, kind: input, shape index: {}]   ;;  %s3938_s10 = inlined_call_operand.vmem [shape: f32[1,32], index: 10, kind: input, shape index: {}]   ;;  %s3939_s12 = inlined_call_operand.vmem [shape: f32[16,256], index: 12, kind: output, shape index: {}]  }
   0x1   :  { %v3407_v0 = vld [vmem:[%s3927_s0] sm:$0xff]  ;;  %v3412_v1 = vld [vmem:[%s3927_s0 + $0x8] sm:$0xff]  ;;  %137 = vmatprep.mubr.bf16.mxu0 %v3324_v7  ;;  %v3197_v9 = vld [vmem:[%s3928_s5 + $0x14] ss:$8 sps:$4 sm:$0xff]   ;;  %s3327_s22 = smov 64   ;;  %s3329_s26 = smov 48  }
   0x2   :  { %v51_v2 = vmul.f32 %v3407_v0, %v3407_v0  ;;  %v52_v3 = vmul.f32 %v3412_v1, %v3412_v1  ;;  %v3194_v6 = vld [vmem:[%s3928_s5 + $0x4] ss:$8 sps:$4 sm:$0xff]   ;;  %v3196_v8 = vld [vmem:[%s3928_s5] ss:$8 sps:$4 sm:$0xff]   ;;  %v3199_v10 = vld [vmem:[%s3928_s5 + $0x10] ss:$8 sps:$4 sm:$0xff]  }
   0x3   :  { %105 = vmatprep.subr.bf16.mxu0 %v3194_v6  ;;  %v48_v11 = vld [vmem:[%s3929_s3] sm:$0xff]  ;;  %v49_v12 = vld [vmem:[%s3929_s3 + $0x8] sm:$0xff]  ;;  %s3330_s0 = smov 120   ;;  %s3331_s27 = smov 112   ;;  %vm3511_vm2 = vmpackc.low %vm204_vm1, %vm204_vm1  ;;  %vm614_vm4 = vcmask 130112   ;;  %vm829_vm5 = vcmask 195712  }
   0x4   :  { %v54_v4 = vsel %vm53_vm0, %v51_v2, 0.0  ;;  %v57_v5 = vsel %vm53_vm0, %v52_v3, 0.0  ;;  %106 = vmatpush1.bf16.msra.mxu0 %v3196_v8  ;;  %180 = vrot.lane.b32.xlu1 %v48_v11, %s3325_s16  ;;  %v3444_v13 = vld [vmem:[%s3930_s2] sm:$0xff]  ;;  %v3451_v14 = vld [vmem:[%s3930_s2 + $0x8] sm:$0xff]  ;;  %s3328_s2 = smov 56   ;;  %s3332_s14 = smov 40  }
   0x5   :  { %55 = vadd.xlane.f32.xlu0 %v54_v4  ;;  %107 = vmatprep.subr.bf16.mxu0 %v3197_v9  ;;  %v2654_v24 = vld [vmem:[%s3931_s4] ss:$0 sm:$0xff]  ;;  %s3333_s15 = smov 104   ;;  %s3335_s18 = smov 16   ;;  %vm3337_vm6 = vmmov 0   ;;  %vm1044_vm7 = vcmask 261312  }
   0x6   :  { %s3338_s24 = smov 24   ;;  %vm1255_vm8 = vcmask 523264  }
   0x8   :  { %108 = vmatpush1.bf16.msra.mxu0 %v3199_v10  ;;  %182 = vrot.lane.b32.xlu1 %v49_v12, %s3325_s16 }
   0x9   :  { %58 = vadd.xlane.f32.xlu0 %v57_v5 }
   0xc   :  { %154 = vrot.lane.b32.xlu1 %v49_v12, %s3326_s17 }
  0x10   :  { %172 = vrot.lane.b32.xlu1 %v3444_v13, %s3327_s22 }
  0x14   :  { %174 = vrot.lane.b32.xlu1 %v3451_v14, %s3327_s22 }
  0x1f   :  { %152 = vrot.lane.b32.xlu0 %v48_v11, %s3326_s17  ;;  %s3334_s17 = smov 8  }
  0x76   :  { %v3461_v29 = vpop.permute.xlu1 %180 }
  0x7a   :  { %v3463_v30 = vpop.permute.xlu1 %182 }
  0x7e   :  { %v3466_v34 = vpop.permute.xlu1 %154 }
  0x82   :  { %v3479_v43 = vpop.permute.xlu1 %172 }
  0x86   :  { %v3481_v44 = vpop.permute.xlu1 %174 }
  0x92   :  { %v56_v15 = vpop.xlane.xlu0 %55 }
  0x93   :  { %v61_v16 = vmul.f32 0.03125, %v56_v15 }
  0x95   :  { %v63_v17 = vadd.f32 1e-06, %v61_v16 }
  0x96   :  { %v59_v18 = vpop.xlane.xlu0 %58 }
  0x97   :  { %3222 = vrsqrt.f32 %v63_v17  ;;  %v62_v19 = vmul.f32 0.03125, %v59_v18  ;;  %v3536_v17 = vld [vmem:[%s3932_s1 + $0x8] sm:$0xff] }
  0x99   :  { %v64_v20 = vadd.f32 1e-06, %v62_v19 }
  0x9a   :  { %v3474_v41 = vpop.permute.xlu0 %152 }
  0x9b   :  { %3224 = vrsqrt.f32 %v64_v20 }
  0xa1   :  { %v3223_v21 = vpop.eup %3222 }
  0xa2   :  { %v67_v22 = vmul.f32 %v3223_v21, %v3407_v0  ;;  %v3541_v21 = vld [vmem:[%s3932_s1] sm:$0xff] }
  0xa4   :  { %v75_v26 = vmul.f32 %v2654_v24, %v67_v22 }
  0xa5   :  { %v3225_v23 = vpop.eup %3224 }
  0xa6   :  { %v68_v25 = vmul.f32 %v3225_v23, %v3412_v1 }
  0xa8   :  { %v76_v27 = vmul.f32 %v2654_v24, %v68_v25 }
  0xaa   :  { %v77_v28 = vpack.c.bf16 %v76_v27, %v75_v26 }
  0xac   :  { %2659 = vmatmul.mubr.msk.bf16.vlgmr.msra.gmra.mrb[0].mxu0 %vm53_vm0, %v77_v28 }
 0x17f   :  { %v139_v31 = vpop.f32.mrb[0].mxu0 }
 0x180   :  { %v141_v32 = vpop.f32.mrb[1].mxu0  ;;  %v186_v33 = vmul.f32 %v3461_v29, %v139_v31  ;;  %v158_v42 = vmul.f32 %v3474_v41, %v139_v31  ;;  %v178_v46 = vmul.f32 %v3479_v43, %v139_v31  ;;  %v148_v51 = vmul.f32 %v139_v31, %v3444_v13 }
 0x181   :  { %v143_v35 = vpop.f32.mrb[2].mxu0 }
 0x182   :  { %190 = vrot.lane.b32.xlu1 %v186_v33, %s3325_s16  ;;  %v145_v36 = vpop.f32.mrb[3].mxu0  ;;  %v159_v37 = vmul.f32 %v3466_v34, %v143_v35  ;;  %v187_v40 = vmul.f32 %v3463_v30, %v143_v35  ;;  %v179_v47 = vmul.f32 %v3481_v44, %v143_v35  ;;  %v149_v56 = vmul.f32 %v143_v35, %v3451_v14 }
 0x183   :  { %v3027_v38 = vpack.c.bf16 %v145_v36, %v141_v32  ;;  %v3470_v39 = vpack.i.bf16 %v145_v36, %v141_v32 }
 0x184   :  { %164 = vrot.lane.b32.xlu0 %v159_v37, %s3325_s16 }
 0x186   :  { %192 = vrot.lane.b32.xlu1 %v187_v40, %s3325_s16 }
 0x18a   :  { %162 = vrot.lane.b32.xlu1 %v158_v42, %s3325_s16 }
 0x1f4   :  { %v191_v45 = vpop.permute.xlu1 %190 }
 0x1f5   :  { %v196_v49 = vadd.f32 %v191_v45, %v178_v46 }
 0x1f6   :  { %v165_v55 = vpop.permute.xlu0 %164 }
 0x1f7   :  { %v3501_v57 = vadd.f32 %v165_v55, %v149_v56 }
 0x1f8   :  { %v193_v48 = vpop.permute.xlu1 %192 }
 0x1f9   :  { %v197_v50 = vadd.f32 %v193_v48, %v179_v47 }
 0x1fb   :  { %v3486_v52 = vpack.i.bf16 %v197_v50, %v196_v49 }
 0x1fc   :  { %v163_v53 = vpop.permute.xlu1 %162 }
 0x1fd   :  { %v3488_v54 = vadd.f32 %v163_v53, %v148_v51  ;;  %3130 = vrot.lane.b32.xlu0 %v3486_v52, %s3328_s2  ;;  %3125 = vrot.lane.b32.xlu1 %v3486_v52, %s3327_s22 }
 0x1ff   :  { %2857 = vmatprep.mubr.msk.f32.mxu1 %vm204_vm1, %v3488_v54 }
 0x201   :  { %3135 = vrot.lane.b32.xlu0 %v3486_v52, %s3329_s26  ;;  %400 = vrot.lane.b32.xlu1 %v3488_v54, %s3330_s0 }
 0x205   :  { %617 = vrot.lane.b32.xlu0 %v3488_v54, %s3331_s27  ;;  %402 = vrot.lane.b32.xlu1 %v3501_v57, %s3330_s0 }
 0x209   :  { %619 = vrot.lane.b32.xlu1 %v3501_v57, %s3331_s27 }
 0x26f   :  { %v3126_v58 = vpop.permute.xlu1 %3125  ;;  %v3131_v59 = vpop.permute.xlu0 %3130 }
 0x270   :  { %v3128_v60 = vunpack.i.h.bf16 %v3126_v58  ;;  %v3127_v61 = vunpack.i.l.bf16 %v3126_v58  ;;  %v3133_v62 = vunpack.i.h.bf16 %v3131_v59  ;;  %v3132_v63 = vunpack.i.l.bf16 %v3131_v59 }
 0x272   :  { %v3031_v3 = vpack.c.bf16 %v3133_v62, %v3132_v63  ;;  %v3021_v4 = vpack.c.bf16 %v3128_v60, %v3127_v61 }
 0x273   :  { %v401_v5 = vpop.permute.xlu1 %400  ;;  %v3136_v6 = vpop.permute.xlu0 %3135 }
 0x274   :  { %v3138_v8 = vunpack.i.h.bf16 %v3136_v6  ;;  %v3137_v9 = vunpack.i.l.bf16 %v3136_v6  ;;  %3023 = vmatprep.subr.msk.bf16.mxu1 %vm3511_vm2, %v3021_v4  ;;  %3033 = vmatprep.subr.msk.bf16.mxu0 %vm3511_vm2, %v3031_v3 }
 0x275   :  { %2871 = vmatprep.mubr.msk.f32.mxu0 %vm204_vm1, %v401_v5  ;;  %3026 = vmatpush3.bf16.xpose.msk.msra.mxu1 %vm3511_vm2, %v3021_v4 }
 0x276   :  { %v3041_v10 = vpack.c.bf16 %v3138_v8, %v3137_v9  ;;  %3036 = vmatpush3.bf16.xpose.msk.msra.mxu0 %vm3511_vm2, %v3031_v3  ;;  %3028 = vmatprep.subr.bf16.mxu1 %v3027_v38 }
 0x277   :  { %v403_v11 = vpop.permute.xlu1 %402  ;;  %v618_v12 = vpop.permute.xlu0 %617 }
 0x278   :  { %3043 = vmatprep.subr.msk.bf16.mxu0 %vm3511_vm2, %v3041_v10 }
 0x27b   :  { %v620_v15 = vpop.permute.xlu1 %619 }
 0x27c   :  { %2858 = vmatmul.mubr.msk.f32.vlgmr.msra.gmra.mrb[0].mxu1 %vm204_vm1, %v3501_v57 }
 0x27d   :  { %2872 = vmatmul.mubr.msk.f32.vlgmr.msra.gmra.mrb[4].mxu0 %vm204_vm1, %v403_v11  ;;  %3030 = vmatpush3.bf16.msra.mxu1 %v3027_v38 }
 0x27e   :  { %3046 = vmatpush3.bf16.xpose.msk.msra.mxu0 %vm3511_vm2, %v3041_v10  ;;  %2885 = vmatprep.mubr.msk.f32.mxu0 %vm204_vm1, %v618_v12 }
 0x285   :  { %2886 = vmatmul.mubr.msk.f32.vlgmr.msra.gmra.mrb[6].mxu0 %vm204_vm1, %v620_v15 }
 0x34f   :  { %v2859_v16 = vpop.f32.mrb[0].mxu1 }
 0x350   :  { %v291_v18 = vmul.f32 0.35355338, %v2859_v16  ;;  %v2873_v19 = vpop.f32.mrb[4].mxu0  ;;  %v281_v20 = vpop.f32.mrb[1].mxu1 }
 0x351   :  { %v290_v22 = vmul.f32 0.35355338, %v281_v20  ;;  %v482_v23 = vpop.f32.mrb[5].mxu0  ;;  %v492_v28 = vmul.f32 0.35355338, %v2873_v19 }
 0x352   :  { %v491_v24 = vmul.f32 0.35355338, %v482_v23  ;;  %v293_v25 = vadd.f32 %v291_v18, %v3536_v17 }
 0x353   :  { %v292_v26 = vadd.f32 %v290_v22, %v3541_v21  ;;  %v494_v38 = vadd.f32 %v492_v28, %v3536_v17 }
 0x354   :  { %v298_v27 = vsel %vm294_vm3, %v293_v25, -inf  ;;  %v493_v32 = vadd.f32 %v491_v24, %v3541_v21 }
 0x355   :  { %299 = vmax.xlane.f32.xlu1 %v298_v27  ;;  %v295_v31 = vsel %vm294_vm3, %v292_v26, -inf  ;;  %v498_v45 = vsel %vm294_vm3, %v494_v38, -inf }
 0x356   :  { %296 = vmax.xlane.f32.xlu0 %v295_v31  ;;  %v495_v37 = vsel %vm294_vm3, %v493_v32, -inf }
 0x358   :  { %v2887_v33 = vpop.f32.mrb[6].mxu0 }
 0x359   :  { %v709_v35 = vmul.f32 0.35355338, %v2887_v33  ;;  %v699_v36 = vpop.f32.mrb[7].mxu0 }
 0x35a   :  { %v708_v40 = vmul.f32 0.35355338, %v699_v36  ;;  %496 = vmax.xlane.f32.xlu0 %v495_v37 }
 0x35b   :  { %v711_v46 = vadd.f32 %v709_v35, %v3536_v17 }
 0x35c   :  { %v710_v42 = vadd.f32 %v708_v40, %v3541_v21 }
 0x35d   :  { %v715_v48 = vsel %vm294_vm3, %v711_v46, -inf }
 0x35e   :  { %v712_v47 = vsel %vm294_vm3, %v710_v42, -inf  ;;  %499 = vmax.xlane.f32.xlu0 %v498_v45 }
 0x35f   :  { %713 = vmax.xlane.f32.xlu1 %v712_v47 }
 0x362   :  { %716 = vmax.xlane.f32.xlu0 %v715_v48 }
 0x370   :  { %3140 = vrot.lane.b32.xlu1 %v3470_v39, %s3330_s0 }
 0x3e2   :  { %v300_v49 = vpop.xlane.xlu1 %299 }
 0x3e3   :  { %v302_v50 = vsub.f32 %v293_v25, %v300_v49  ;;  %v297_v51 = vpop.xlane.xlu0 %296 }
 0x3e4   :  { %v301_v53 = vsub.f32 %v292_v26, %v297_v51 }
 0x3e5   :  { %v305_v55 = vmul.f32 1.442695, %v302_v50 }
 0x3e6   :  { %v303_v56 = vmul.f32 1.442695, %v301_v53 }
 0x3e7   :  { %3226 = vpow2.f32 %v305_v55  ;;  %v497_v58 = vpop.xlane.xlu0 %496 }
 0x3e8   :  { %3228 = vpow2.f32 %v303_v56  ;;  %v501_v59 = vsub.f32 %v493_v32, %v497_v58 }
 0x3ea   :  { %v503_v60 = vmul.f32 1.442695, %v501_v59 }
 0x3eb   :  { %v500_v61 = vpop.xlane.xlu0 %499 }
 0x3ec   :  { %3230 = vpow2.f32 %v503_v60  ;;  %v714_v62 = vpop.xlane.xlu1 %713  ;;  %v502_v63 = vsub.f32 %v494_v38, %v500_v61 }
 0x3ed   :  { %v718_v26 = vsub.f32 %v710_v42, %v714_v62 }
 0x3ee   :  { %v505_v3 = vmul.f32 1.442695, %v502_v63 }
 0x3ef   :  { %v717_v4 = vpop.xlane.xlu0 %716  ;;  %v720_v27 = vmul.f32 1.442695, %v718_v26 }
 0x3f0   :  { %3232 = vpow2.f32 %v505_v3  ;;  %v3141_v5 = vpop.permute.xlu1 %3140  ;;  %v719_v6 = vsub.f32 %v711_v46, %v717_v4 }
 0x3f1   :  { %v3227_v8 = vpop.eup %3226  ;;  %v3143_v9 = vunpack.i.h.bf16 %v3141_v5  ;;  %v3142_v10 = vunpack.i.l.bf16 %v3141_v5 }
 0x3f2   :  { %v3229_v11 = vpop.eup %3228  ;;  %v722_v12 = vmul.f32 1.442695, %v719_v6  ;;  %v310_v15 = vsel %vm294_vm3, %v3227_v8, 0.0 }
 0x3f3   :  { %v3037_v16 = vpack.c.bf16 %v3143_v9, %v3142_v10  ;;  %311 = vadd.xlane.f32.xlu0 %v310_v15  ;;  %v307_v18 = vsel %vm294_vm3, %v3229_v11, 0.0 }
 0x3f4   :  { %3234 = vpow2.f32 %v722_v12  ;;  %308 = vadd.xlane.f32.xlu1 %v307_v18 }
 0x3f5   :  { %3038 = vmatprep.subr.bf16.mxu1 %v3037_v16  ;;  %3236 = vpow2.f32 %v720_v27 }
 0x3f6   :  { %v3231_v19 = vpop.eup %3230 }
 0x3f7   :  { %v507_v20 = vsel %vm294_vm3, %v3231_v19, 0.0 }
 0x3f8   :  { %508 = vadd.xlane.f32.xlu1 %v507_v20 }
 0x3fa   :  { %v3233_v22 = vpop.eup %3232 }
 0x3fb   :  { %v510_v23 = vsel %vm294_vm3, %v3233_v22, 0.0 }
 0x3fc   :  { %511 = vadd.xlane.f32.xlu0 %v510_v23 }
 0x3fe   :  { %v3235_v24 = vpop.eup %3234 }
 0x3ff   :  { %v727_v25 = vsel %vm294_vm3, %v3235_v24, 0.0  ;;  %v3237_v28 = vpop.eup %3236 }
 0x400   :  { %728 = vadd.xlane.f32.xlu0 %v727_v25  ;;  %v724_v31 = vsel %vm294_vm3, %v3237_v28, 0.0 }
 0x409   :  { %3150 = vrot.lane.b32.xlu1 %v3486_v52, %s3332_s14 }
 0x416   :  { %3145 = vrot.lane.b32.xlu0 %v3470_v39, %s3331_s27 }
 0x41a   :  { %834 = vrot.lane.b32.xlu0 %v3501_v57, %s3333_s15 }
 0x42d   :  { %725 = vadd.xlane.f32.xlu1 %v724_v31 }
 0x43e   :  { %832 = vrot.lane.b32.xlu1 %v3488_v54, %s3333_s15 }
 0x480   :  { %v312_v32 = vpop.xlane.xlu0 %311 }
 0x481   :  { %3238 = vrcp.f32 %v312_v32  ;;  %v309_v52 = vpop.xlane.xlu1 %308 }
 0x482   :  { %3240 = vrcp.f32 %v309_v52 }
 0x485   :  { %v509_v33 = vpop.xlane.xlu1 %508 }
 0x486   :  { %3242 = vrcp.f32 %v509_v33 }
 0x489   :  { %v512_v35 = vpop.xlane.xlu0 %511  ;;  %v3151_v45 = vpop.permute.xlu1 %3150 }
 0x48a   :  { %3244 = vrcp.f32 %v512_v35  ;;  %v3153_v49 = vunpack.i.h.bf16 %v3151_v45  ;;  %v3152_v50 = vunpack.i.l.bf16 %v3151_v45 }
 0x48b   :  { %v3239_v36 = vpop.eup %3238 }
 0x48c   :  { %v3241_v37 = vpop.eup %3240  ;;  %v316_v40 = vmul.f32 %v3239_v36, %v3227_v8  ;;  %v3051_v56 = vpack.c.bf16 %v3153_v49, %v3152_v50  ;;  %v3336_v50 = vmov 0.0  }
 0x48d   :  { %v729_v57 = vpop.xlane.xlu0 %728  ;;  %v315_v38 = vmul.f32 %v3241_v37, %v3229_v11  ;;  %2909 = vmatprep.subr.bf16.mxu0 %v3336_v50  ;;  %2913 = vmatprep.mubr.msk.bf16.mxu0 %vm3337_vm6, %v3336_v50 }
 0x48e   :  { %3246 = vrcp.f32 %v729_v57 }
 0x48f   :  { %2864 = vmatprep.mubr.msk.f32.mxu1 %vm294_vm3, %v315_v38 }
 0x490   :  { %v3243_v42 = vpop.eup %3242  ;;  %2865 = vmatmul.mubr.msk.f32.vlgmr.msra.gmra.mrb[2].mxu1 %vm294_vm3, %v316_v40 }
 0x491   :  { %3040 = vmatpush3.bf16.msra.mxu1 %v3037_v16  ;;  %v3146_v54 = vpop.permute.xlu0 %3145  ;;  %v515_v46 = vmul.f32 %v3243_v42, %v3231_v19 }
 0x492   :  { %v3148_v47 = vunpack.i.h.bf16 %v3146_v54  ;;  %v3147_v48 = vunpack.i.l.bf16 %v3146_v54 }
 0x493   :  { %2878 = vmatprep.mubr.msk.f32.mxu1 %vm294_vm3, %v515_v46 }
 0x494   :  { %v3245_v51 = vpop.eup %3244  ;;  %v3047_v53 = vpack.c.bf16 %v3148_v47, %v3147_v48 }
 0x495   :  { %v516_v55 = vmul.f32 %v3245_v51, %v3233_v22  ;;  %v835_v3 = vpop.permute.xlu0 %834  ;;  %v3200_v51 = vld [vmem:[%s3933_s6] sm:$0xff]  }
 0x496   :  { %3048 = vmatprep.subr.bf16.mxu1 %v3047_v53  ;;  %2910 = vmatpush3.bf16.msra.mxu0 %v3200_v51 }
 0x497   :  { %2879 = vmatmul.mubr.msk.f32.vlgmr.msra.gmra.mrb[4].mxu1 %vm294_vm3, %v516_v55  ;;  %2911 = vmatprep.subr.bf16.mxu0 %v3336_v50 }
 0x498   :  { %3050 = vmatpush3.bf16.msra.mxu1 %v3047_v53  ;;  %v3247_v59 = vpop.eup %3246  ;;  %v3201_v53 = vld [vmem:[%s3933_s6 + $0x8] sm:$0xff]  }
 0x499   :  { %3053 = vmatprep.subr.msk.bf16.mxu1 %vm3511_vm2, %v3051_v56  ;;  %v733_v62 = vmul.f32 %v3247_v59, %v3235_v24 }
 0x49a   :  { %2912 = vmatpush3.bf16.msra.mxu0 %v3201_v53 }
 0x49b   :  { %2925 = vmatprep.subr.bf16.mxu0 %v3336_v50 }
 0x4ba   :  { %v726_v58 = vpop.xlane.xlu1 %725 }
 0x4bb   :  { %3248 = vrcp.f32 %v726_v58 }
 0x4be   :  { %v833_v63 = vpop.permute.xlu1 %832 }
 0x4c5   :  { %v3249_v60 = vpop.eup %3248 }
 0x4c6   :  { %v732_v61 = vmul.f32 %v3249_v60, %v3237_v28 }
 0x4c8   :  { %2892 = vmatprep.mubr.msk.f32.mxu1 %vm294_vm3, %v732_v61 }
 0x4c9   :  { %2893 = vmatmul.mubr.msk.f32.vlgmr.msra.gmra.mrb[6].mxu1 %vm294_vm3, %v733_v62 }
 0x4ca   :  { %3056 = vmatpush3.bf16.xpose.msk.msra.mxu1 %vm3511_vm2, %v3051_v56  ;;  %2899 = vmatprep.mubr.msk.f32.mxu1 %vm204_vm1, %v833_v63 }
 0x4d1   :  { %2900 = vmatmul.mubr.msk.f32.vlgmr.msra.gmra.mrb[8].mxu1 %vm204_vm1, %v835_v3 }
 0x563   :  { %v2866_v4 = vpop.f32.mrb[2].mxu1 }
 0x564   :  { %399 = vst.msk [vmem:[#allocation2 + $0x8] sm:$0xff] %vm204_vm1, %v2866_v4  ;;  %v389_v5 = vpop.f32.mrb[3].mxu1 }
 0x565   :  { %398 = vst.msk [vmem:[#allocation2] sm:$0xff] %vm204_vm1, %v389_v5 }
 0x56a   :  { %v2880_v6 = vpop.f32.mrb[4].mxu1 }
 0x56b   :  { %v597_v8 = vpop.f32.mrb[5].mxu1 }
 0x59c   :  { %v2894_v9 = vpop.f32.mrb[6].mxu1 }
 0x59d   :  { %v812_v10 = vpop.f32.mrb[7].mxu1 }
 0x5a4   :  { %v2901_v11 = vpop.f32.mrb[8].mxu1 }
 0x5a5   :  { %v924_v12 = vmul.f32 0.35355338, %v2901_v11  ;;  %v914_v15 = vpop.f32.mrb[9].mxu1 }
 0x5a6   :  { %v923_v16 = vmul.f32 0.35355338, %v914_v15 }
 0x5a7   :  { %v926_v18 = vadd.f32 %v924_v12, %v3536_v17 }
 0x5a8   :  { %v925_v19 = vadd.f32 %v923_v16, %v3541_v21 }
 0x5a9   :  { %v930_v20 = vsel %vm294_vm3, %v926_v18, -inf }
 0x5aa   :  { %931 = vmax.xlane.f32.xlu0 %v930_v20  ;;  %v927_v22 = vsel %vm294_vm3, %v925_v19, -inf }
 0x5ab   :  { %928 = vmax.xlane.f32.xlu1 %v927_v22 }
 0x637   :  { %v932_v23 = vpop.xlane.xlu0 %931 }
 0x638   :  { %v934_v24 = vsub.f32 %v926_v18, %v932_v23  ;;  %v929_v25 = vpop.xlane.xlu1 %928 }
 0x639   :  { %v933_v26 = vsub.f32 %v925_v19, %v929_v25 }
 0x63a   :  { %v937_v27 = vmul.f32 1.442695, %v934_v24 }
 0x63b   :  { %v935_v28 = vmul.f32 1.442695, %v933_v26  ;;  %v2687_v26 = vld [vmem:[%s3935_s7] ss:$0 sm:$0xff] }
 0x63c   :  { %3250 = vpow2.f32 %v937_v27 }
 0x63d   :  { %3252 = vpow2.f32 %v935_v28 }
 0x646   :  { %v3251_v31 = vpop.eup %3250 }
 0x647   :  { %v3253_v32 = vpop.eup %3252  ;;  %v942_v52 = vsel %vm294_vm3, %v3251_v31, 0.0 }
 0x648   :  { %943 = vadd.xlane.f32.xlu1 %v942_v52  ;;  %v939_v33 = vsel %vm294_vm3, %v3253_v32, 0.0  ;;  %v3204_v52 = vld [vmem:[%s3936_s9] sm:$0xff]  }
 0x649   :  { %940 = vadd.xlane.f32.xlu0 %v939_v33  ;;  %v3205_v33 = vld [vmem:[%s3936_s9 + $0x8] sm:$0xff]  }
 0x659   :  { %608 = vrot.lane.b32.xlu1 %v597_v8, %s3334_s17 }
 0x65d   :  { %610 = vrot.lane.b32.xlu1 %v2880_v6, %s3334_s17 }
 0x65f   :  { %3155 = vrot.lane.b32.xlu0 %v3470_v39, %s3333_s15 }
 0x661   :  { %825 = vrot.lane.b32.xlu1 %v2894_v9, %s3335_s18 }
 0x663   :  { %823 = vrot.lane.b32.xlu0 %v812_v10, %s3335_s18 }
 0x6d5   :  { %v944_v35 = vpop.xlane.xlu1 %943 }
 0x6d6   :  { %3254 = vrcp.f32 %v944_v35  ;;  %v941_v36 = vpop.xlane.xlu0 %940  ;;  %v3206_v35 = vld [vmem:[%s3936_s9 + $0x10] sm:$0xff]  }
 0x6d7   :  { %3256 = vrcp.f32 %v941_v36 }
 0x6d9   :  { %v609_v37 = vpop.permute.xlu1 %608 }
 0x6da   :  { %615 = vst.msk [vmem:[#allocation2] sm:$0xff] %vm614_vm4, %v609_v37  ;;  %v3156_v57 = vpop.permute.xlu0 %3155 }
 0x6db   :  { %v3158_v38 = vunpack.i.h.bf16 %v3156_v57  ;;  %v3157_v40 = vunpack.i.l.bf16 %v3156_v57 }
 0x6dd   :  { %v3057_v42 = vpack.c.bf16 %v3158_v38, %v3157_v40  ;;  %v611_v45 = vpop.permute.xlu1 %610 }
 0x6de   :  { %616 = vst.msk [vmem:[#allocation2 + $0x8] sm:$0xff] %vm614_vm4, %v611_v45  ;;  %v824_v39 = vpop.permute.xlu0 %823 }
 0x6df   :  { %830 = vst.msk [vmem:[#allocation2] sm:$0xff] %vm829_vm5, %v824_v39  ;;  %3058 = vmatprep.subr.bf16.mxu1 %v3057_v42 }
 0x6e0   :  { %v3255_v54 = vpop.eup %3254  ;;  %3060 = vmatpush3.bf16.msra.mxu1 %v3057_v42 }
 0x6e1   :  { %v3257_v46 = vpop.eup %3256  ;;  %v826_v47 = vpop.permute.xlu1 %825  ;;  %v948_v49 = vmul.f32 %v3255_v54, %v3251_v31  ;;  %2917 = vmatprep.subr.bf16.mxu1 %v3336_v50 }
 0x6e2   :  { %831 = vst.msk [vmem:[#allocation2 + $0x8] sm:$0xff] %vm829_vm5, %v826_v47  ;;  %v947_v48 = vmul.f32 %v3257_v46, %v3253_v32 }
 0x6e4   :  { %2906 = vmatprep.mubr.msk.f32.mxu1 %vm294_vm3, %v947_v48 }
 0x6e5   :  { %2907 = vmatmul.mubr.msk.f32.vlgmr.msra.gmra.mrb[10].mxu1 %vm294_vm3, %v948_v49 }
 0x6e6   :  { %2921 = vmatprep.mubr.msk.bf16.mxu1 %vm3337_vm6, %v3336_v50 }
 0x7b8   :  { %v2908_v55 = vpop.f32.mrb[10].mxu1 }
 0x7b9   :  { %1040 = vrot.lane.b32.xlu1 %v2908_v55, %s3338_s24  ;;  %v1027_v56 = vpop.f32.mrb[11].mxu1 }
 0x7ba   :  { %1038 = vrot.lane.b32.xlu0 %v1027_v56, %s3338_s24 }
 0x82b   :  { %v1041_v58 = vpop.permute.xlu1 %1040 }
 0x82c   :  { %1046 = vst.msk [vmem:[#allocation2 + $0x8] sm:$0xff] %vm1044_vm7, %v1041_v58  ;;  %v1039_v59 = vpop.permute.xlu0 %1038 }
 0x82d   :  { %1045 = vst.msk [vmem:[#allocation2] sm:$0xff] %vm1044_vm7, %v1039_v59 }
 0x833   :  { %v1048_v60 = vld [vmem:[#allocation2 + $0x8] sm:$0xff] }
 0x834   :  { %v1047_v61 = vld [vmem:[#allocation2] sm:$0xff] }
 0x835   :  { %v1049_v62 = vpack.c.bf16 %v1048_v60, %v1047_v61 }
 0x837   :  { %2914 = vmatmul.mubr.msk.bf16.vlgmr.msra.gmra.mrb[8].mxu0 %vm53_vm0, %v1049_v62 }
 0x838   :  { %2933 = vmatprep.mubr.msk.bf16.mxu0 %vm3337_vm6, %v3336_v50  ;;  %2926 = vmatpush3.bf16.msra.mxu0 %v3204_v52 }
 0x839   :  { %2927 = vmatprep.subr.bf16.mxu0 %v3336_v50 }
 0x83c   :  { %2928 = vmatpush3.bf16.msra.mxu0 %v3205_v33 }
 0x83d   :  { %2929 = vmatprep.subr.bf16.mxu0 %v3336_v50 }
 0x840   :  { %2930 = vmatpush3.bf16.msra.mxu0 %v3206_v35 }
 0x841   :  { %2931 = vmatprep.subr.bf16.mxu0 %v3336_v50 }
 0x90a   :  { %v1103_v63 = vpop.f32.mrb[8].mxu0 }
 0x90b   :  { %v3625_v3 = vadd.f32 %v1103_v63, %v3407_v0  ;;  %v2915_v4 = vpop.f32.mrb[9].mxu0  ;;  %v3202_v0 = vld [vmem:[%s3934_s8] sm:$0xff]  }
 0x90c   :  { %v1106_v5 = vpop.f32.mrb[10].mxu0  ;;  %2918 = vmatpush3.bf16.msra.mxu1 %v3202_v0  ;;  %v3213_v0 = vld [vmem:[%s3928_s5 + $0x34] ss:$8 sps:$4 sm:$0xff]  }
 0x90d   :  { %v3628_v6 = vadd.f32 %v1106_v5, %v3412_v1  ;;  %v2916_v8 = vpop.f32.mrb[11].mxu0  ;;  %v1113_v9 = vmul.f32 %v3625_v3, %v3625_v3  ;;  %2919 = vmatprep.subr.bf16.mxu1 %v3336_v50  ;;  %v3203_v1 = vld [vmem:[%s3934_s8 + $0x8] sm:$0xff]  }
 0x90f   :  { %v1115_v10 = vsel %vm53_vm0, %v1113_v9, 0.0  ;;  %v1114_v11 = vmul.f32 %v3628_v6, %v3628_v6 }
 0x910   :  { %1116 = vadd.xlane.f32.xlu0 %v1115_v10  ;;  %2920 = vmatpush3.bf16.msra.mxu1 %v3203_v1 }
 0x911   :  { %v1118_v12 = vsel %vm53_vm0, %v1114_v11, 0.0 }
 0x912   :  { %1119 = vadd.xlane.f32.xlu1 %v1118_v12  ;;  %v3211_v12 = vld [vmem:[%s3928_s5 + $0x30] ss:$8 sps:$4 sm:$0xff]  }
 0x99d   :  { %v1117_v15 = vpop.xlane.xlu0 %1116 }
 0x99e   :  { %v1121_v16 = vmul.f32 0.03125, %v1117_v15 }
 0x99f   :  { %v1120_v18 = vpop.xlane.xlu1 %1119 }
 0x9a0   :  { %v1123_v19 = vadd.f32 1e-06, %v1121_v16  ;;  %v1122_v20 = vmul.f32 0.03125, %v1120_v18 }
 0x9a2   :  { %3258 = vrsqrt.f32 %v1123_v19  ;;  %v1124_v22 = vadd.f32 1e-06, %v1122_v20 }
 0x9a4   :  { %3260 = vrsqrt.f32 %v1124_v22 }
 0x9ac   :  { %v3259_v23 = vpop.eup %3258 }
 0x9ad   :  { %v1127_v24 = vmul.f32 %v3259_v23, %v3625_v3 }
 0x9ae   :  { %v3261_v25 = vpop.eup %3260 }
 0x9af   :  { %v1128_v27 = vmul.f32 %v3261_v25, %v3628_v6  ;;  %v1135_v28 = vmul.f32 %v2687_v26, %v1127_v24  ;;  %v2699_v25 = vld [vmem:[%s3931_s4 + $0x1] ss:$0 sm:$0xff] }
 0x9b1   :  { %v1136_v31 = vmul.f32 %v2687_v26, %v1128_v27 }
 0x9b3   :  { %v1137_v32 = vpack.c.bf16 %v1136_v31, %v1135_v28 }
 0x9b5   :  { %2922 = vmatmul.mubr.msk.bf16.vlgmr.msra.gmra.mrb[12].mxu1 %vm53_vm0, %v1137_v32 }
 0x9b6   :  { %1389 = vmatprep.mubr.bf16.mxu1 %v3324_v7  ;;  %v3207_v7 = vld [vmem:[%s3936_s9 + $0x18] sm:$0xff]  }
 0x9b7   :  { %2932 = vmatpush3.bf16.msra.mxu0 %v3207_v7 }
 0xa88   :  { %v1191_v36 = vpop.f32.mrb[12].mxu1 }
 0xa89   :  { %1214 = vrot.lane.b32.xlu0 %v1191_v36, %s3327_s22  ;;  %v2923_v37 = vpop.f32.mrb[13].mxu1  ;;  %v2691_v40 = vmul.f32 -1.442695, %v1191_v36 }
 0xa8a   :  { %v1194_v57 = vpop.f32.mrb[14].mxu1 }
 0xa8b   :  { %1216 = vrot.lane.b32.xlu1 %v1194_v57, %s3327_s22  ;;  %v2924_v38 = vpop.f32.mrb[15].mxu1  ;;  %v2692_v42 = vmul.f32 -1.442695, %v1194_v57  ;;  %3262 = vpow2.f32 %v2691_v40 }
 0xa8d   :  { %3264 = vpow2.f32 %v2692_v42 }
 0xa95   :  { %v3263_v45 = vpop.eup %3262 }
 0xa96   :  { %v1204_v54 = vadd.f32 1.0, %v3263_v45 }
 0xa97   :  { %v3265_v39 = vpop.eup %3264 }
 0xa98   :  { %v1205_v46 = vadd.f32 1.0, %v3265_v39  ;;  %3266 = vrcp.f32 %v1204_v54 }
 0xa9a   :  { %3268 = vrcp.f32 %v1205_v46 }
 0xaa2   :  { %v3267_v47 = vpop.eup %3266 }
 0xaa3   :  { %v1210_v51 = vmul.f32 %v3267_v47, %v1191_v36 }
 0xaa4   :  { %v3269_v48 = vpop.eup %3268 }
 0xaa5   :  { %v1211_v53 = vmul.f32 %v3269_v48, %v1194_v57 }
 0xafb   :  { %v1215_v49 = vpop.permute.xlu0 %1214 }
 0xafc   :  { %v1220_v56 = vmul.f32 %v1215_v49, %v1210_v51 }
 0xafd   :  { %v1217_v55 = vpop.permute.xlu1 %1216 }
 0xafe   :  { %v1221_v58 = vmul.f32 %v1217_v55, %v1211_v53 }
 0xb00   :  { %v1222_v59 = vpack.c.bf16 %v1221_v58, %v1220_v56 }
 0xb02   :  { %2934 = vmatmul.mubr.msk.bf16.vlgmr.msra.gmra.mrb[12].mxu0 %vm1255_vm8, %v1222_v59 }
 0xbd5   :  { %v1293_v60 = vpop.f32.mrb[12].mxu0 }
 0xbd6   :  { %v3669_v61 = vadd.f32 %v1293_v60, %v3625_v3  ;;  %v2935_v62 = vpop.f32.mrb[13].mxu0  ;;  %v3210_v3 = vld [vmem:[%s3928_s5 + $0x24] ss:$8 sps:$4 sm:$0xff]  }
 0xbd7   :  { %v1296_v63 = vpop.f32.mrb[14].mxu0  ;;  %1357 = vmatprep.subr.bf16.mxu1 %v3210_v3 }
 0xbd8   :  { %v3672_v4 = vadd.f32 %v1296_v63, %v3628_v6  ;;  %v2936_v5 = vpop.f32.mrb[15].mxu0  ;;  %v1304_v8 = vmul.f32 %v3669_v61, %v3669_v61  ;;  %v3208_v6 = vld [vmem:[%s3928_s5 + $0x20] ss:$8 sps:$4 sm:$0xff]  }
 0xbd9   :  { %1358 = vmatpush1.bf16.msra.mxu1 %v3208_v6 }
 0xbda   :  { %v1306_v9 = vsel %vm53_vm0, %v1304_v8, 0.0  ;;  %v1305_v10 = vmul.f32 %v3672_v4, %v3672_v4  ;;  %1359 = vmatprep.subr.bf16.mxu1 %v3213_v0 }
 0xbdb   :  { %1307 = vadd.xlane.f32.xlu0 %v1306_v9 }
 0xbdc   :  { %v1309_v11 = vsel %vm53_vm0, %v1305_v10, 0.0 }
 0xbdd   :  { %1310 = vadd.xlane.f32.xlu1 %v1309_v11  ;;  %1360 = vmatpush1.bf16.msra.mxu1 %v3211_v12 }
 0xc68   :  { %v1308_v1 = vpop.xlane.xlu0 %1307 }
 0xc69   :  { %v1312_v15 = vmul.f32 0.03125, %v1308_v1 }
 0xc6a   :  { %v1311_v16 = vpop.xlane.xlu1 %1310 }
 0xc6b   :  { %v1314_v18 = vadd.f32 1e-06, %v1312_v15  ;;  %v1313_v19 = vmul.f32 0.03125, %v1311_v16 }
 0xc6d   :  { %3270 = vrsqrt.f32 %v1314_v18  ;;  %v1315_v20 = vadd.f32 1e-06, %v1313_v19 }
 0xc6f   :  { %3272 = vrsqrt.f32 %v1315_v20 }
 0xc77   :  { %v3271_v22 = vpop.eup %3270 }
 0xc78   :  { %v1318_v23 = vmul.f32 %v3271_v22, %v3669_v61 }
 0xc79   :  { %v3273_v24 = vpop.eup %3272 }
 0xc7a   :  { %v1319_v26 = vmul.f32 %v3273_v24, %v3672_v4  ;;  %v1326_v27 = vmul.f32 %v2699_v25, %v1318_v23 }
 0xc7c   :  { %v1327_v28 = vmul.f32 %v2699_v25, %v1319_v26 }
 0xc7e   :  { %v1328_v31 = vpack.c.bf16 %v1327_v28, %v1326_v27 }
 0xc80   :  { %2708 = vmatmul.mubr.msk.bf16.vlgmr.msra.gmra.mrb[16].mxu1 %vm53_vm0, %v1328_v31 }
 0xd53   :  { %v1391_v32 = vpop.f32.mrb[16].mxu1 }
 0xd54   :  { %v1393_v52 = vpop.f32.mrb[17].mxu1  ;;  %v1416_v33 = vmul.f32 %v1391_v32, %v3461_v29  ;;  %v1402_v38 = vmul.f32 %v1391_v32, %v3474_v41  ;;  %v1414_v42 = vmul.f32 %v1391_v32, %v3479_v43  ;;  %v1400_v46 = vmul.f32 %v1391_v32, %v3444_v13 }
 0xd55   :  { %v1395_v35 = vpop.f32.mrb[18].mxu1 }
 0xd56   :  { %1420 = vrot.lane.b32.xlu0 %v1416_v33, %s3325_s16  ;;  %v1397_v7 = vpop.f32.mrb[19].mxu1  ;;  %v1417_v36 = vmul.f32 %v1395_v35, %v3463_v30  ;;  %v1403_v40 = vmul.f32 %v1395_v35, %v3466_v34  ;;  %v1415_v45 = vmul.f32 %v1395_v35, %v3481_v44  ;;  %v1401_v43 = vmul.f32 %v1395_v35, %v3451_v14 }
 0xd57   :  { %v3067_v37 = vpack.c.bf16 %v1397_v7, %v1393_v52  ;;  %v3701_v57 = vpack.i.bf16 %v1397_v7, %v1393_v52 }
 0xd58   :  { %1422 = vrot.lane.b32.xlu1 %v1417_v36, %s3325_s16 }
 0xd5a   :  { %1406 = vrot.lane.b32.xlu0 %v1402_v38, %s3325_s16 }
 0xd5c   :  { %1408 = vrot.lane.b32.xlu1 %v1403_v40, %s3325_s16 }
 0xdc8   :  { %v1421_v29 = vpop.permute.xlu0 %1420 }
 0xdc9   :  { %v1426_v30 = vadd.f32 %v1421_v29, %v1414_v42 }
 0xdca   :  { %v1423_v39 = vpop.permute.xlu1 %1422 }
 0xdcb   :  { %v1427_v54 = vadd.f32 %v1423_v39, %v1415_v45 }
 0xdcc   :  { %v1407_v47 = vpop.permute.xlu0 %1406 }
 0xdcd   :  { %v3711_v48 = vadd.f32 %v1407_v47, %v1400_v46  ;;  %v3713_v41 = vpack.i.bf16 %v1427_v54, %v1426_v30 }
 0xdce   :  { %v1409_v34 = vpop.permute.xlu1 %1408 }
 0xdcf   :  { %2941 = vmatprep.mubr.msk.f32.mxu1 %vm204_vm1, %v3711_v48  ;;  %3160 = vrot.lane.b32.xlu0 %v3713_v41, %s3327_s22  ;;  %v3726_v13 = vadd.f32 %v1409_v34, %v1401_v43 }
 0xdd0   :  { %3165 = vrot.lane.b32.xlu1 %v3713_v41, %s3328_s2 }
 0xdd3   :  { %1628 = vrot.lane.b32.xlu0 %v3711_v48, %s3330_s0 }
 0xdd4   :  { %3170 = vrot.lane.b32.xlu1 %v3713_v41, %s3329_s26 }
 0xdd7   :  { %1630 = vrot.lane.b32.xlu0 %v3726_v13, %s3330_s0 }
 0xdd8   :  { %1844 = vrot.lane.b32.xlu1 %v3711_v48, %s3331_s27 }
 0xddb   :  { %1846 = vrot.lane.b32.xlu0 %v3726_v13, %s3331_s27 }
 0xe41   :  { %v3161_v44 = vpop.permute.xlu0 %3160 }
 0xe42   :  { %v3163_v49 = vunpack.i.h.bf16 %v3161_v44  ;;  %v3162_v14 = vunpack.i.l.bf16 %v3161_v44  ;;  %v3166_v51 = vpop.permute.xlu1 %3165 }
 0xe43   :  { %v3168_v53 = vunpack.i.h.bf16 %v3166_v51  ;;  %v3167_v55 = vunpack.i.l.bf16 %v3166_v51 }
 0xe44   :  { %v3061_v56 = vpack.c.bf16 %v3163_v49, %v3162_v14 }
 0xe45   :  { %v3071_v58 = vpack.c.bf16 %v3168_v53, %v3167_v55  ;;  %v1629_v59 = vpop.permute.xlu0 %1628 }
 0xe46   :  { %v3171_v60 = vpop.permute.xlu1 %3170  ;;  %3063 = vmatprep.subr.msk.bf16.mxu1 %vm3511_vm2, %v3061_v56  ;;  %2955 = vmatprep.mubr.msk.f32.mxu0 %vm204_vm1, %v1629_v59 }
 0xe47   :  { %v3173_v62 = vunpack.i.h.bf16 %v3171_v60  ;;  %v3172_v63 = vunpack.i.l.bf16 %v3171_v60  ;;  %3073 = vmatprep.subr.msk.bf16.mxu0 %vm3511_vm2, %v3071_v58  ;;  %3066 = vmatpush3.bf16.xpose.msk.msra.mxu1 %vm3511_vm2, %v3061_v56 }
 0xe48   :  { %3076 = vmatpush3.bf16.xpose.msk.msra.mxu0 %vm3511_vm2, %v3071_v58  ;;  %3068 = vmatprep.subr.bf16.mxu1 %v3067_v37 }
 0xe49   :  { %v3081_v5 = vpack.c.bf16 %v3173_v62, %v3172_v63  ;;  %v1631_v8 = vpop.permute.xlu0 %1630 }
 0xe4a   :  { %v1845_v9 = vpop.permute.xlu1 %1844 }
 0xe4b   :  { %3083 = vmatprep.subr.msk.bf16.mxu0 %vm3511_vm2, %v3081_v5 }
 0xe4d   :  { %v1847_v10 = vpop.permute.xlu0 %1846 }
 0xe4e   :  { %2942 = vmatmul.mubr.msk.f32.vlgmr.msra.gmra.mrb[20].mxu1 %vm204_vm1, %v3726_v13 }
 0xe4f   :  { %2956 = vmatmul.mubr.msk.f32.vlgmr.msra.gmra.mrb[16].mxu0 %vm204_vm1, %v1631_v8  ;;  %3070 = vmatpush3.bf16.msra.mxu1 %v3067_v37 }
 0xe50   :  { %3086 = vmatpush3.bf16.xpose.msk.msra.mxu0 %vm3511_vm2, %v3081_v5  ;;  %2969 = vmatprep.mubr.msk.f32.mxu0 %vm204_vm1, %v1845_v9 }
 0xe57   :  { %2970 = vmatmul.mubr.msk.f32.vlgmr.msra.gmra.mrb[18].mxu0 %vm204_vm1, %v1847_v10 }
 0xf21   :  { %v2943_v11 = vpop.f32.mrb[20].mxu1 }
 0xf22   :  { %v1520_v3 = vmul.f32 0.35355338, %v2943_v11  ;;  %v2957_v6 = vpop.f32.mrb[16].mxu0  ;;  %v1510_v12 = vpop.f32.mrb[21].mxu1 }
 0xf23   :  { %v1720_v0 = vmul.f32 0.35355338, %v2957_v6  ;;  %v1519_v1 = vmul.f32 0.35355338, %v1510_v12  ;;  %v1710_v15 = vpop.f32.mrb[17].mxu0 }
 0xf24   :  { %v1719_v16 = vmul.f32 0.35355338, %v1710_v15  ;;  %v1522_v18 = vadd.f32 %v1520_v3, %v3536_v17 }
 0xf25   :  { %v1521_v19 = vadd.f32 %v1519_v1, %v3541_v21  ;;  %v1722_v24 = vadd.f32 %v1720_v0, %v3536_v17 }
 0xf26   :  { %v1526_v20 = vsel %vm294_vm3, %v1522_v18, -inf  ;;  %v1721_v22 = vadd.f32 %v1719_v16, %v3541_v21 }
 0xf27   :  { %1527 = vmax.xlane.f32.xlu0 %v1526_v20  ;;  %v1523_v23 = vsel %vm294_vm3, %v1521_v19, -inf  ;;  %v1726_v31 = vsel %vm294_vm3, %v1722_v24, -inf }
 0xf28   :  { %1524 = vmax.xlane.f32.xlu1 %v1523_v23  ;;  %v1723_v26 = vsel %vm294_vm3, %v1721_v22, -inf }
 0xf2a   :  { %v2971_v25 = vpop.f32.mrb[18].mxu0 }
 0xf2b   :  { %v1936_v27 = vmul.f32 0.35355338, %v2971_v25  ;;  %v1926_v28 = vpop.f32.mrb[19].mxu0  ;;  %1724 = vmax.xlane.f32.xlu0 %v1723_v26 }
 0xf2c   :  { %v1935_v32 = vmul.f32 0.35355338, %v1926_v28  ;;  %1727 = vmax.xlane.f32.xlu1 %v1726_v31 }
 0xf2d   :  { %v1938_v52 = vadd.f32 %v1936_v27, %v3536_v17 }
 0xf2e   :  { %v1937_v33 = vadd.f32 %v1935_v32, %v3541_v21 }
 0xf2f   :  { %v1942_v35 = vsel %vm294_vm3, %v1938_v52, -inf }
 0xf30   :  { %1943 = vmax.xlane.f32.xlu1 %v1942_v35  ;;  %v1939_v7 = vsel %vm294_vm3, %v1937_v33, -inf }
 0xf31   :  { %1940 = vmax.xlane.f32.xlu0 %v1939_v7 }
 0xfb4   :  { %v1528_v36 = vpop.xlane.xlu0 %1527 }
 0xfb5   :  { %v1530_v37 = vsub.f32 %v1522_v18, %v1528_v36  ;;  %v1525_v38 = vpop.xlane.xlu1 %1524 }
 0xfb6   :  { %v1529_v40 = vsub.f32 %v1521_v19, %v1525_v38 }
 0xfb7   :  { %v1533_v29 = vmul.f32 1.442695, %v1530_v37 }
 0xfb8   :  { %v1531_v42 = vmul.f32 1.442695, %v1529_v40  ;;  %v1725_v45 = vpop.xlane.xlu0 %1724 }
 0xfb9   :  { %3274 = vpow2.f32 %v1533_v29  ;;  %v1729_v39 = vsub.f32 %v1721_v22, %v1725_v45  ;;  %v1728_v30 = vpop.xlane.xlu1 %1727 }
 0xfba   :  { %3276 = vpow2.f32 %v1531_v42  ;;  %v1730_v17 = vsub.f32 %v1722_v24, %v1728_v30 }
 0xfbb   :  { %v1731_v54 = vmul.f32 1.442695, %v1729_v39 }
 0xfbc   :  { %v1733_v21 = vmul.f32 1.442695, %v1730_v17 }
 0xfbd   :  { %3278 = vpow2.f32 %v1731_v54  ;;  %v1944_v46 = vpop.xlane.xlu1 %1943 }
 0xfbe   :  { %3280 = vpow2.f32 %v1733_v21  ;;  %v1946_v47 = vsub.f32 %v1938_v52, %v1944_v46  ;;  %v1941_v34 = vpop.xlane.xlu0 %1940  ;;  %v3322_v46 = vld [vmem:[%s3932_s1 + $0x8] sm:$0xff] }
 0xfbf   :  { %v1945_v43 = vsub.f32 %v1937_v33, %v1941_v34  ;;  %v3323_v34 = vld [vmem:[%s3932_s1] sm:$0xff] }
 0xfc0   :  { %v1949_v44 = vmul.f32 1.442695, %v1946_v47 }
 0xfc1   :  { %v1947_v49 = vmul.f32 1.442695, %v1945_v43 }
 0xfc2   :  { %3282 = vpow2.f32 %v1949_v44 }
 0xfc3   :  { %v3275_v14 = vpop.eup %3274  ;;  %3284 = vpow2.f32 %v1947_v49 }
 0xfc4   :  { %v3277_v51 = vpop.eup %3276  ;;  %v1538_v53 = vsel %vm294_vm3, %v3275_v14, 0.0 }
 0xfc5   :  { %1539 = vadd.xlane.f32.xlu1 %v1538_v53  ;;  %v1535_v55 = vsel %vm294_vm3, %v3277_v51, 0.0 }
 0xfc6   :  { %1536 = vadd.xlane.f32.xlu0 %v1535_v55 }
 0xfc7   :  { %v3279_v56 = vpop.eup %3278 }
 0xfc8   :  { %v3281_v58 = vpop.eup %3280  ;;  %v1735_v59 = vsel %vm294_vm3, %v3279_v56, 0.0 }
 0xfc9   :  { %v1738_v60 = vsel %vm294_vm3, %v3281_v58, 0.0 }
 0xfca   :  { %1739 = vadd.xlane.f32.xlu1 %v1738_v60  ;;  %1736 = vadd.xlane.f32.xlu0 %v1735_v59 }
 0xfcc   :  { %v3283_v62 = vpop.eup %3282 }
 0xfcd   :  { %v3285_v63 = vpop.eup %3284  ;;  %v1954_v5 = vsel %vm294_vm3, %v3283_v62, 0.0 }
 0xfce   :  { %1955 = vadd.xlane.f32.xlu1 %v1954_v5  ;;  %v1951_v8 = vsel %vm294_vm3, %v3285_v63, 0.0 }
 0xfcf   :  { %1952 = vadd.xlane.f32.xlu0 %v1951_v8 }
 0xfdf   :  { %3180 = vrot.lane.b32.xlu1 %v3701_v57, %s3331_s27 }
 0xfe3   :  { %3185 = vrot.lane.b32.xlu1 %v3713_v41, %s3332_s14 }
 0xfe5   :  { %3175 = vrot.lane.b32.xlu0 %v3701_v57, %s3330_s0 }
 0xfe7   :  { %2060 = vrot.lane.b32.xlu1 %v3726_v13, %s3333_s15 }
 0xfe9   :  { %2058 = vrot.lane.b32.xlu0 %v3711_v48, %s3333_s15 }
0x1052   :  { %v1540_v9 = vpop.xlane.xlu1 %1539 }
0x1053   :  { %3286 = vrcp.f32 %v1540_v9  ;;  %v1537_v10 = vpop.xlane.xlu0 %1536 }
0x1054   :  { %3288 = vrcp.f32 %v1537_v10 }
0x1057   :  { %v1740_v11 = vpop.xlane.xlu1 %1739  ;;  %v1737_v3 = vpop.xlane.xlu0 %1736 }
0x1058   :  { %3290 = vrcp.f32 %v1737_v3 }
0x1059   :  { %3292 = vrcp.f32 %v1740_v11 }
0x105b   :  { %v1956_v6 = vpop.xlane.xlu1 %1955 }
0x105c   :  { %v1953_v12 = vpop.xlane.xlu0 %1952 }
0x105d   :  { %v3287_v41 = vpop.eup %3286  ;;  %3294 = vrcp.f32 %v1953_v12 }
0x105e   :  { %v3289_v0 = vpop.eup %3288  ;;  %3296 = vrcp.f32 %v1956_v6  ;;  %v1544_v13 = vmul.f32 %v3287_v41, %v3275_v14 }
0x105f   :  { %v3181_v1 = vpop.permute.xlu1 %3180  ;;  %v1543_v15 = vmul.f32 %v3289_v0, %v3277_v51 }
0x1060   :  { %v3176_v16 = vpop.permute.xlu0 %3175  ;;  %v3183_v18 = vunpack.i.h.bf16 %v3181_v1  ;;  %v3182_v48 = vunpack.i.l.bf16 %v3181_v1 }
0x1061   :  { %v3178_v19 = vunpack.i.h.bf16 %v3176_v16  ;;  %v3177_v20 = vunpack.i.l.bf16 %v3176_v16  ;;  %2948 = vmatprep.mubr.msk.f32.mxu1 %vm294_vm3, %v1543_v15  ;;  %v3214_v16 = vld [vmem:[%s3933_s6 + $0x10] sm:$0xff]  }
0x1062   :  { %2949 = vmatmul.mubr.msk.f32.vlgmr.msra.gmra.mrb[22].mxu1 %vm294_vm3, %v1544_v13  ;;  %v3291_v22 = vpop.eup %3290  ;;  %v3087_v27 = vpack.c.bf16 %v3183_v18, %v3182_v48  ;;  %v3215_v18 = vld [vmem:[%s3933_s6 + $0x18] sm:$0xff]  }
0x1063   :  { %v3077_v23 = vpack.c.bf16 %v3178_v19, %v3177_v20  ;;  %v3186_v24 = vpop.permute.xlu1 %3185  ;;  %v3293_v25 = vpop.eup %3292  ;;  %v1743_v26 = vmul.f32 %v3291_v22, %v3279_v56 }
0x1064   :  { %v3188_v28 = vunpack.i.h.bf16 %v3186_v24  ;;  %v3187_v31 = vunpack.i.l.bf16 %v3186_v24  ;;  %v1744_v52 = vmul.f32 %v3293_v25, %v3281_v58  ;;  %v2059_v37 = vpop.permute.xlu0 %2058 }
0x1065   :  { %3078 = vmatprep.subr.bf16.mxu1 %v3077_v23  ;;  %2962 = vmatprep.mubr.msk.f32.mxu1 %vm294_vm3, %v1743_v26 }
0x1066   :  { %3080 = vmatpush3.bf16.msra.mxu1 %v3077_v23  ;;  %v3091_v7 = vpack.c.bf16 %v3188_v28, %v3187_v31 }
0x1067   :  { %v3295_v32 = vpop.eup %3294  ;;  %3088 = vmatprep.subr.bf16.mxu1 %v3087_v27  ;;  %v2061_v38 = vpop.permute.xlu1 %2060 }
0x1068   :  { %v3297_v33 = vpop.eup %3296  ;;  %v1959_v35 = vmul.f32 %v3295_v32, %v3285_v63 }
0x1069   :  { %2963 = vmatmul.mubr.msk.f32.vlgmr.msra.gmra.mrb[24].mxu1 %vm294_vm3, %v1744_v52  ;;  %v1960_v36 = vmul.f32 %v3297_v33, %v3283_v62 }
0x106a   :  { %3090 = vmatpush3.bf16.msra.mxu1 %v3087_v27  ;;  %2976 = vmatprep.mubr.msk.f32.mxu1 %vm294_vm3, %v1959_v35 }
0x106b   :  { %3093 = vmatprep.subr.msk.bf16.mxu1 %vm3511_vm2, %v3091_v7 }
0x106d   :  { %2977 = vmatmul.mubr.msk.f32.vlgmr.msra.gmra.mrb[26].mxu1 %vm294_vm3, %v1960_v36 }
0x106e   :  { %2983 = vmatprep.mubr.msk.f32.mxu1 %vm204_vm1, %v2059_v37 }
0x1073   :  { %3096 = vmatpush3.bf16.xpose.msk.msra.mxu1 %vm3511_vm2, %v3091_v7 }
0x1074   :  { %3001 = vmatprep.subr.bf16.mxu1 %v3336_v50 }
0x107a   :  { %2984 = vmatmul.mubr.msk.f32.vlgmr.msra.gmra.mrb[28].mxu1 %vm204_vm1, %v2061_v38 }
0x107b   :  { %3005 = vmatprep.mubr.msk.bf16.mxu1 %vm3337_vm6, %v3336_v50 }
0x1135   :  { %v2950_v40 = vpop.f32.mrb[22].mxu1 }
0x1136   :  { %1627 = vst.msk [vmem:[#allocation2 + $0x8] sm:$0xff] %vm204_vm1, %v2950_v40  ;;  %v1617_v29 = vpop.f32.mrb[23].mxu1 }
0x1137   :  { %1626 = vst.msk [vmem:[#allocation2] sm:$0xff] %vm204_vm1, %v1617_v29 }
0x113c   :  { %v2964_v42 = vpop.f32.mrb[24].mxu1 }
0x113d   :  { %v1825_v45 = vpop.f32.mrb[25].mxu1 }
0x1140   :  { %v2978_v39 = vpop.f32.mrb[26].mxu1 }
0x1141   :  { %v2039_v30 = vpop.f32.mrb[27].mxu1 }
0x114d   :  { %v2985_v2 = vpop.f32.mrb[28].mxu1 }
0x114e   :  { %v2150_v17 = vmul.f32 0.35355338, %v2985_v2  ;;  %v2140_v54 = vpop.f32.mrb[29].mxu1 }
0x114f   :  { %v2149_v21 = vmul.f32 0.35355338, %v2140_v54 }
0x1150   :  { %v2152_v47 = vadd.f32 %v3322_v46, %v2150_v17  ;;  %v2741_v17 = vld [vmem:[%s3935_s7 + $0x1] ss:$0 sm:$0xff] }
0x1151   :  { %v2151_v43 = vadd.f32 %v3323_v34, %v2149_v21  ;;  %v3218_v34 = vld [vmem:[%s3936_s9 + $0x20] sm:$0xff]  }
0x1152   :  { %v2156_v44 = vsel %vm294_vm3, %v2152_v47, -inf }
0x1153   :  { %2157 = vmax.xlane.f32.xlu1 %v2156_v44  ;;  %v2153_v49 = vsel %vm294_vm3, %v2151_v43, -inf  ;;  %v3220_v44 = vld [vmem:[%s3936_s9 + $0x30] sm:$0xff]  }
0x1154   :  { %2154 = vmax.xlane.f32.xlu0 %v2153_v49  ;;  %v3221_v49 = vld [vmem:[%s3936_s9 + $0x38] sm:$0xff]  }
0x1164   :  { %3190 = vrot.lane.b32.xlu1 %v3701_v57, %s3333_s15 }
0x1168   :  { %1838 = vrot.lane.b32.xlu1 %v2964_v42, %s3334_s17 }
0x116c   :  { %2050 = vrot.lane.b32.xlu1 %v2039_v30, %s3335_s18 }
0x11e0   :  { %v2158_v14 = vpop.xlane.xlu1 %2157 }
0x11e1   :  { %v2160_v51 = vsub.f32 %v2152_v47, %v2158_v14  ;;  %v2155_v53 = vpop.xlane.xlu0 %2154 }
0x11e2   :  { %v2159_v55 = vsub.f32 %v2151_v43, %v2155_v53  ;;  %v3219_v43 = vld [vmem:[%s3936_s9 + $0x28] sm:$0xff]  }
0x11e3   :  { %v2163_v56 = vmul.f32 1.442695, %v2160_v51 }
0x11e4   :  { %v2161_v58 = vmul.f32 1.442695, %v2159_v55  ;;  %v3191_v59 = vpop.permute.xlu1 %3190 }
0x11e5   :  { %v3193_v60 = vunpack.i.h.bf16 %v3191_v59  ;;  %v3192_v62 = vunpack.i.l.bf16 %v3191_v59 }
0x11e6   :  { %3298 = vpow2.f32 %v2161_v58 }
0x11e7   :  { %v3097_v63 = vpack.c.bf16 %v3193_v60, %v3192_v62  ;;  %3300 = vpow2.f32 %v2163_v56 }
0x11e8   :  { %v1839_v5 = vpop.permute.xlu1 %1838 }
0x11e9   :  { %1843 = vst.msk [vmem:[#allocation2 + $0x8] sm:$0xff] %vm614_vm4, %v1839_v5  ;;  %3098 = vmatprep.subr.bf16.mxu0 %v3097_v63 }
0x11ea   :  { %3100 = vmatpush3.bf16.msra.mxu0 %v3097_v63 }
0x11eb   :  { %2993 = vmatprep.subr.bf16.mxu0 %v3336_v50 }
0x11ec   :  { %v2051_v12 = vpop.permute.xlu1 %2050 }
0x11f0   :  { %v3299_v57 = vpop.eup %3298 }
0x11f1   :  { %v2165_v8 = vsel %vm294_vm3, %v3299_v57, 0.0  ;;  %v3301_v9 = vpop.eup %3300 }
0x11f2   :  { %2166 = vadd.xlane.f32.xlu0 %v2165_v8  ;;  %v2168_v10 = vsel %vm294_vm3, %v3301_v9, 0.0 }
0x11f6   :  { %2169 = vadd.xlane.f32.xlu0 %v2168_v10 }
0x120c   :  { %1836 = vrot.lane.b32.xlu0 %v1825_v45, %s3334_s17 }
0x1210   :  { %2052 = vrot.lane.b32.xlu0 %v2978_v39, %s3335_s18 }
0x127f   :  { %v2167_v11 = vpop.xlane.xlu0 %2166 }
0x1280   :  { %3302 = vrcp.f32 %v2167_v11 }
0x1283   :  { %v2170_v3 = vpop.xlane.xlu0 %2169 }
0x1284   :  { %3304 = vrcp.f32 %v2170_v3 }
0x1287   :  { %v1837_v6 = vpop.permute.xlu0 %1836 }
0x1288   :  { %1842 = vst.msk [vmem:[#allocation2] sm:$0xff] %vm614_vm4, %v1837_v6 }
0x1289   :  { %2056 = vst.msk [vmem:[#allocation2] sm:$0xff] %vm829_vm5, %v2051_v12 }
0x128a   :  { %v3303_v41 = vpop.eup %3302 }
0x128b   :  { %v2053_v0 = vpop.permute.xlu0 %2052  ;;  %v2173_v1 = vmul.f32 %v3303_v41, %v3299_v57 }
0x128c   :  { %2057 = vst.msk [vmem:[#allocation2 + $0x8] sm:$0xff] %vm829_vm5, %v2053_v0 }
0x128d   :  { %2990 = vmatprep.mubr.msk.f32.mxu0 %vm294_vm3, %v2173_v1 }
0x128e   :  { %v3305_v15 = vpop.eup %3304 }
0x128f   :  { %v2174_v13 = vmul.f32 %v3305_v15, %v3301_v9 }
0x1291   :  { %2991 = vmatmul.mubr.msk.f32.vlgmr.msra.gmra.mrb[20].mxu0 %vm294_vm3, %v2174_v13 }
0x1292   :  { %2997 = vmatprep.mubr.msk.bf16.mxu0 %vm3337_vm6, %v3336_v50  ;;  %2994 = vmatpush3.bf16.msra.mxu0 %v3214_v16 }
0x1293   :  { %2995 = vmatprep.subr.bf16.mxu0 %v3336_v50 }
0x1296   :  { %2996 = vmatpush3.bf16.msra.mxu0 %v3215_v18 }
0x1297   :  { %3009 = vmatprep.subr.bf16.mxu0 %v3336_v50 }
0x1364   :  { %v2992_v48 = vpop.f32.mrb[20].mxu0 }
0x1365   :  { %2266 = vrot.lane.b32.xlu0 %v2992_v48, %s3338_s24  ;;  %v2253_v19 = vpop.f32.mrb[21].mxu0 }
0x1366   :  { %2264 = vrot.lane.b32.xlu1 %v2253_v19, %s3338_s24 }
0x13d7   :  { %v2267_v20 = vpop.permute.xlu0 %2266 }
0x13d8   :  { %2271 = vst.msk [vmem:[#allocation2 + $0x8] sm:$0xff] %vm1044_vm7, %v2267_v20  ;;  %v2265_v22 = vpop.permute.xlu1 %2264 }
0x13d9   :  { %2270 = vst.msk [vmem:[#allocation2] sm:$0xff] %vm1044_vm7, %v2265_v22  ;;  %v2556_v22 = vld [vmem:[%s3937_s11 + $0x8] sm:$0xff] }
0x13df   :  { %v2273_v23 = vld [vmem:[#allocation2 + $0x8] sm:$0xff] }
0x13e0   :  { %v2272_v24 = vld [vmem:[#allocation2] sm:$0xff] }
0x13e1   :  { %v2274_v25 = vpack.c.bf16 %v2273_v23, %v2272_v24  ;;  %v2558_v23 = vld [vmem:[%s3937_s11 + $0x18] sm:$0xff] }
0x13e2   :  { %v3101_v24 = vpack.c.bf16 %v2558_v23, %v2556_v22 }
0x13e3   :  { %2998 = vmatmul.mubr.msk.bf16.vlgmr.msra.gmra.mrb[24].mxu0 %vm53_vm0, %v2274_v25  ;;  %v2555_v25 = vld [vmem:[%s3937_s11] sm:$0xff] }
0x13e4   :  { %3017 = vmatprep.mubr.msk.bf16.mxu0 %vm3337_vm6, %v3336_v50  ;;  %3010 = vmatpush3.bf16.msra.mxu0 %v3218_v34 }
0x13e5   :  { %3011 = vmatprep.subr.bf16.mxu0 %v3336_v50 }
0x13e8   :  { %3012 = vmatpush3.bf16.msra.mxu0 %v3219_v43 }
0x13e9   :  { %3013 = vmatprep.subr.bf16.mxu0 %v3336_v50 }
0x13ec   :  { %3014 = vmatpush3.bf16.msra.mxu0 %v3220_v44 }
0x13ed   :  { %3015 = vmatprep.subr.bf16.mxu0 %v3336_v50 }
0x13f0   :  { %3016 = vmatpush3.bf16.msra.mxu0 %v3221_v49 }
0x14b6   :  { %v2329_v26 = vpop.f32.mrb[24].mxu0 }
0x14b7   :  { %v3838_v27 = vadd.f32 %v2329_v26, %v3669_v61  ;;  %v2999_v28 = vpop.f32.mrb[25].mxu0  ;;  %v3216_v61 = vld [vmem:[%s3934_s8 + $0x10] sm:$0xff]  }
0x14b8   :  { %v2332_v31 = vpop.f32.mrb[26].mxu0  ;;  %3002 = vmatpush3.bf16.msra.mxu1 %v3216_v61  ;;  %v2557_v26 = vld [vmem:[%s3937_s11 + $0x10] sm:$0xff]  ;;  %v2560_v28 = vld [vmem:[%s3937_s11 + $0x28] sm:$0xff] }
0x14b9   :  { %v3841_v32 = vadd.f32 %v2332_v31, %v3672_v4  ;;  %v3000_v52 = vpop.f32.mrb[27].mxu0  ;;  %v2340_v33 = vmul.f32 %v3838_v27, %v3838_v27  ;;  %3003 = vmatprep.subr.bf16.mxu1 %v3336_v50  ;;  %v3217_v4 = vld [vmem:[%s3934_s8 + $0x18] sm:$0xff]  }
0x14ba   :  { %v2562_v31 = vld [vmem:[%s3937_s11 + $0x38] sm:$0xff]  ;;  %v2559_v52 = vld [vmem:[%s3937_s11 + $0x20] sm:$0xff] }
0x14bb   :  { %v2342_v35 = vsel %vm53_vm0, %v2340_v33, 0.0  ;;  %v2341_v7 = vmul.f32 %v3841_v32, %v3841_v32  ;;  %v2561_v33 = vld [vmem:[%s3937_s11 + $0x30] sm:$0xff] }
0x14bc   :  { %2343 = vadd.xlane.f32.xlu1 %v2342_v35  ;;  %3004 = vmatpush3.bf16.msra.mxu1 %v3217_v4  ;;  %v3107_v35 = vpack.c.bf16 %v2561_v33, %v2559_v52 }
0x14bd   :  { %v2345_v36 = vsel %vm53_vm0, %v2341_v7, 0.0  ;;  %3102 = vmatprep.subr.bf16.mxu1 %v3101_v24 }
0x14be   :  { %2346 = vadd.xlane.f32.xlu0 %v2345_v36 }
0x1549   :  { %v2344_v37 = vpop.xlane.xlu1 %2343 }
0x154a   :  { %v2348_v38 = vmul.f32 0.03125, %v2344_v37 }
0x154b   :  { %v2347_v40 = vpop.xlane.xlu0 %2346 }
0x154c   :  { %v2350_v29 = vadd.f32 1e-06, %v2348_v38  ;;  %v2349_v42 = vmul.f32 0.03125, %v2347_v40 }
0x154e   :  { %3306 = vrsqrt.f32 %v2350_v29  ;;  %v2351_v45 = vadd.f32 1e-06, %v2349_v42  ;;  %v2764_v29 = vld [vmem:[%s3938_s10] ss:$0 sm:$0xff] }
0x1550   :  { %3308 = vrsqrt.f32 %v2351_v45 }
0x1558   :  { %v3307_v39 = vpop.eup %3306 }
0x1559   :  { %v2354_v30 = vmul.f32 %v3307_v39, %v3838_v27 }
0x155a   :  { %v3309_v2 = vpop.eup %3308 }
0x155b   :  { %v2355_v54 = vmul.f32 %v3309_v2, %v3841_v32  ;;  %v2362_v21 = vmul.f32 %v2741_v17, %v2354_v30 }
0x155d   :  { %v2363_v46 = vmul.f32 %v2741_v17, %v2355_v54 }
0x155f   :  { %v2364_v47 = vpack.c.bf16 %v2363_v46, %v2362_v21 }
0x1561   :  { %3006 = vmatmul.mubr.msk.bf16.vlgmr.msra.gmra.mrb[32].mxu1 %vm53_vm0, %v2364_v47 }
0x1562   :  { %2633 = vmatprep.mubr.f32.mxu1 %v3336_v50 }
0x1634   :  { %v2419_v14 = vpop.f32.mrb[32].mxu1 }
0x1635   :  { %2442 = vrot.lane.b32.xlu0 %v2419_v14, %s3327_s22  ;;  %v3007_v51 = vpop.f32.mrb[33].mxu1  ;;  %v2749_v56 = vmul.f32 -1.442695, %v2419_v14 }
0x1636   :  { %v2422_v53 = vpop.f32.mrb[34].mxu1 }
0x1637   :  { %2444 = vrot.lane.b32.xlu1 %v2422_v53, %s3327_s22  ;;  %v3008_v55 = vpop.f32.mrb[35].mxu1  ;;  %v2750_v58 = vmul.f32 -1.442695, %v2422_v53  ;;  %3310 = vpow2.f32 %v2749_v56 }
0x1639   :  { %3312 = vpow2.f32 %v2750_v58 }
0x1641   :  { %v3311_v59 = vpop.eup %3310 }
0x1642   :  { %v2432_v62 = vadd.f32 1.0, %v3311_v59 }
0x1643   :  { %v3313_v60 = vpop.eup %3312 }
0x1644   :  { %v2433_v63 = vadd.f32 1.0, %v3313_v60  ;;  %3314 = vrcp.f32 %v2432_v62 }
0x1646   :  { %3316 = vrcp.f32 %v2433_v63 }
0x164e   :  { %v3315_v5 = vpop.eup %3314 }
0x164f   :  { %v2438_v9 = vmul.f32 %v3315_v5, %v2419_v14 }
0x1650   :  { %v3317_v57 = vpop.eup %3316 }
0x1651   :  { %v2439_v10 = vmul.f32 %v3317_v57, %v2422_v53 }
0x16a7   :  { %v2443_v8 = vpop.permute.xlu0 %2442 }
0x16a8   :  { %v2448_v3 = vmul.f32 %v2443_v8, %v2438_v9 }
0x16a9   :  { %v2445_v11 = vpop.permute.xlu1 %2444 }
0x16aa   :  { %v2449_v6 = vmul.f32 %v2445_v11, %v2439_v10 }
0x16ac   :  { %v2450_v12 = vpack.c.bf16 %v2449_v6, %v2448_v3 }
0x16ae   :  { %3018 = vmatmul.mubr.msk.bf16.vlgmr.msra.gmra.mrb[28].mxu0 %vm1255_vm8, %v2450_v12 }
0x1781   :  { %v2521_v41 = vpop.f32.mrb[28].mxu0 }
0x1782   :  { %v2528_v0 = vadd.f32 %v2521_v41, %v3838_v27  ;;  %v3019_v1 = vpop.f32.mrb[29].mxu0  ;;  %v3103_v27 = vpack.c.bf16 %v2557_v26, %v2555_v25 }
0x1783   :  { %v2524_v15 = vpop.f32.mrb[30].mxu0 }
0x1784   :  { %v2531_v13 = vmul.f32 %v2528_v0, %v2528_v0  ;;  %v2529_v16 = vadd.f32 %v2524_v15, %v3841_v32  ;;  %v3020_v18 = vpop.f32.mrb[31].mxu0  ;;  %3104 = vmatpush1.bf16.msra.mxu1 %v3103_v27  ;;  %v3105_v32 = vpack.c.bf16 %v2562_v31, %v2560_v28 }
0x1786   :  { %v2533_v48 = vsel %vm53_vm0, %v2531_v13, 0.0  ;;  %v2532_v19 = vmul.f32 %v2529_v16, %v2529_v16  ;;  %3106 = vmatprep.subr.bf16.mxu1 %v3105_v32 }
0x1787   :  { %2534 = vadd.xlane.f32.xlu1 %v2533_v48 }
0x1788   :  { %v2536_v20 = vsel %vm53_vm0, %v2532_v19, 0.0  ;;  %3108 = vmatpush1.bf16.msra.mxu1 %v3107_v35 }
0x1789   :  { %2537 = vadd.xlane.f32.xlu0 %v2536_v20 }
0x1814   :  { %v2535_v7 = vpop.xlane.xlu1 %2534 }
0x1815   :  { %v2539_v36 = vmul.f32 0.03125, %v2535_v7 }
0x1816   :  { %v2538_v61 = vpop.xlane.xlu0 %2537 }
0x1817   :  { %v2541_v4 = vadd.f32 1e-06, %v2539_v36  ;;  %v2540_v37 = vmul.f32 0.03125, %v2538_v61 }
0x1819   :  { %3318 = vrsqrt.f32 %v2541_v4  ;;  %v2542_v38 = vadd.f32 1e-06, %v2540_v37 }
0x181b   :  { %3320 = vrsqrt.f32 %v2542_v38 }
0x1823   :  { %v3319_v40 = vpop.eup %3318 }
0x1824   :  { %v2545_v42 = vmul.f32 %v3319_v40, %v2528_v0 }
0x1825   :  { %v3321_v45 = vpop.eup %3320 }
0x1826   :  { %v2553_v39 = vmul.f32 %v2764_v29, %v2545_v42  ;;  %v2546_v30 = vmul.f32 %v3321_v45, %v2529_v16 }
0x1828   :  { %2765 = vmatmul.mubr.msk.f32.vlgmr.msra.gmra.mrb[30].mxu1 %vm53_vm0, %v2553_v39  ;;  %v2554_v2 = vmul.f32 %v2764_v29, %v2546_v30 }
0x1829   :  { %2639 = vmatprep.mubr.f32.mxu1 %v3336_v50 }
0x182c   :  { %2766 = vmatmul.mubr.msk.f32.gmra.mrb[36].mxu1 %vm53_vm0, %v2554_v2 }
0x18fb   :  { %v2635_v17 = vpop.f32.mrb[30].mxu1 }
0x18fc   :  { %2646 = vst [vmem:[%s3939_s12] sm:$0xff] %v2635_v17  ;;  %v2637_v54 = vpop.f32.mrb[31].mxu1 }
0x18fd   :  { %2647 = vst [vmem:[%s3939_s12 + $0x8] sm:$0xff] %v2637_v54 }
0x18ff   :  { %v2641_v21 = vpop.f32.mrb[36].mxu1 }
0x1900   :  { %2648 = vst [vmem:[%s3939_s12 + $0x10] sm:$0xff] %v2641_v21  ;;  %v2643_v46 = vpop.f32.mrb[37].mxu1 }
0x1901   :  { %2649 = vst [vmem:[%s3939_s12 + $0x18] sm:$0xff] %v2643_v46 }

</bundles_post_ra>
